<compile_context>
chip_gen: v6e
topology: v6e:2x2x1
jax: 0.10.0
libtpu: 0.0.40
codegen_flags: <defaults>
</compile_context>

<pallas_src>
import functools

import jax
import jax.numpy as jnp
from jax.experimental import pallas as pl
from jax.experimental.pallas import tpu as pltpu

# Raise the scoped VMEM limit beyond the 16/32 MiB defaults (safe on v5e/v6e/v7x).
_VMEM_LIMIT_BYTES = 48 * 1024 * 1024

# Weight dtype for the MXU operands. float32 keeps exact reference numerics everywhere;
# set to jnp.bfloat16 on v6e/v7x (large H) for ~2x MXU throughput and half the weight
# DMA / resident-VMEM footprint. Gate nonlinearities and the cell state stay float32.
MATMUL_WEIGHT_DTYPE = jnp.float32


# ----------------------------------------------------------------------------
# Pallas kernels
# ----------------------------------------------------------------------------
def _input_proj_kernel(x_ref, w_ref, b_ref, o_ref, *, n_slabs, slab_dim):
    """gates_x = concat(x_slabs) @ W_ih^T + (b_ih + b_hh) for one (direction, time-chunk).

    x_ref : (n_slabs, Tc, B, slab_dim)   previous-layer activations (or embeddings)
    w_ref : (1, n_slabs*slab_dim, 4H)    per-direction input weights (pre-transposed)
    b_ref : (1, 1, 4H)
    o_ref : (1, Tc, B, 4H)
    """
    tc, b = x_ref.shape[1], x_ref.shape[2]
    four_h = o_ref.shape[-1]
    acc = jnp.zeros((tc * b, four_h), jnp.float32)
    for s in range(n_slabs):  # static loop; concat-then-matmul == sum of split matmuls
        xs = x_ref[s].reshape(tc * b, slab_dim)
        ws = w_ref[0, s * slab_dim:(s + 1) * slab_dim, :]
        acc = acc + jnp.dot(xs.astype(ws.dtype), ws, preferred_element_type=jnp.float32)
    acc = acc + b_ref[0]
    o_ref[0] = acc.reshape(tc, b, four_h)


def _lstm_recurrence_kernel(gx_ref, whh_ref, h0_ref, c0_ref,
                            y_ref, hN_ref, cN_ref, h_scr, c_scr, *, tc, hidden):
    """Serial part of one bidirectional LSTM layer.

    Grid = (direction, time-chunk) with direction "parallel", time "arbitrary".
    Direction 1 (backward) sees its chunks in reversed order via the index_maps and walks
    each chunk back-to-front, so outputs land at the original time positions (no flips).
    Only the h @ W_hh^T matmul remains on the serial critical path.
    """
    d = pl.program_id(0)
    t = pl.program_id(1)

    @pl.when(t == 0)
    def _():
        h_scr[...] = h0_ref[0]
        c_scr[...] = c0_ref[0]

    whh = whh_ref[0]               # (H, 4H), resident for the whole chunk
    gx_chunk = gx_ref.at[0]        # (Tc, B, 4H) ref view
    y_chunk = y_ref.at[0]          # (Tc, B, H)  ref view

    def step(i, carry):
        idx = i + d * (tc - 1 - 2 * i)     # forward: i ; backward: tc-1-i
        gx = gx_chunk[idx]                 # (B, 4H) precomputed x @ W_ih^T + b
        h = h_scr[...]
        c = c_scr[...]
        gates = gx + jnp.dot(h.astype(whh.dtype), whh,
                             preferred_element_type=jnp.float32)
        i_g = jax.nn.sigmoid(gates[:, 0 * hidden:1 * hidden])
        f_g = jax.nn.sigmoid(gates[:, 1 * hidden:2 * hidden])
        g_g = jnp.tanh(gates[:, 2 * hidden:3 * hidden])
        o_g = jax.nn.sigmoid(gates[:, 3 * hidden:4 * hidden])
        c_new = f_g * c + i_g * g_g
        h_new = o_g * jnp.tanh(c_new)
        h_scr[...] = h_new
        c_scr[...] = c_new
        y_chunk[idx] = h_new
        return carry

    jax.lax.fori_loop(0, tc, step, 0, unroll=True)

    hN_ref[0] = h_scr[...]
    cN_ref[0] = c_scr[...]


def _fc_kernel(x_ref, w_ref, b_ref, o_ref):
    """One (row-tile, vocab-tile) of the final linear projection."""
    x = x_ref[...].astype(w_ref.dtype)
    o_ref[...] = (jnp.dot(x, w_ref[...], preferred_element_type=jnp.float32)
                  + b_ref[...])


# ----------------------------------------------------------------------------
# Pallas wrappers
# ----------------------------------------------------------------------------
def _time_chunk(T, cap=32):
    tc = min(T, cap)
    while T % tc:
        tc -= 1
    return tc


def _pick_tile(dim, cap, align):
    if dim <= cap:
        return dim
    for t in range(cap, 0, -1):
        if dim % t == 0 and t % align == 0:
            return t
    return dim  # fall back to the full (untiled) dimension


def lstm_input_projection(x_slabs, wih_t, b):
    """x_slabs: (n_slabs, T, B, slab_dim) -> gates_x (2, T, B, 4H) for both directions."""
    n_slabs, T, B, slab_dim = x_slabs.shape
    four_h = wih_t.shape[-1]
    tc = _time_chunk(T)
    kernel = functools.partial(_input_proj_kernel, n_slabs=n_slabs, slab_dim=slab_dim)
    return pl.pallas_call(
        kernel,
        out_shape=jax.ShapeDtypeStruct((2, T, B, four_h), jnp.float32),
        grid_spec=pltpu.PrefetchScalarGridSpec(
            num_scalar_prefetch=0,
            grid=(2, T // tc),
            in_specs=[
                pl.BlockSpec((n_slabs, tc, B, slab_dim), lambda d, t: (0, t, 0, 0)),
                pl.BlockSpec((1, n_slabs * slab_dim, four_h), lambda d, t: (d, 0, 0)),
                pl.BlockSpec((1, 1, four_h), lambda d, t: (d, 0, 0)),
            ],
            out_specs=pl.BlockSpec((1, tc, B, four_h), lambda d, t: (d, t, 0, 0)),
        ),
        compiler_params=pltpu.CompilerParams(
            dimension_semantics=("parallel", "parallel"),
            vmem_limit_bytes=_VMEM_LIMIT_BYTES),
    )(x_slabs, wih_t, b)


def lstm_bidir_recurrence(gates_x, whh_t, h0, c0):
    """gates_x: (2,T,B,4H); whh_t: (2,H,4H); h0,c0: (2,B,H).

    Returns y (2,T,B,H) (dir 0 = forward, dir 1 = backward, both in original time order),
    h_n (2,B,H), c_n (2,B,H).
    """
    _, T, B, four_h = gates_x.shape
    H = whh_t.shape[1]
    tc = _time_chunk(T)
    n_tc = T // tc

    def time_block(d, t):  # forward chunks in order; backward chunks reversed
        return t + d * (n_tc - 1 - 2 * t)

    kernel = functools.partial(_lstm_recurrence_kernel, tc=tc, hidden=H)
    return pl.pallas_call(
        kernel,
        out_shape=(jax.ShapeDtypeStruct((2, T, B, H), jnp.float32),
                   jax.ShapeDtypeStruct((2, B, H), jnp.float32),
                   jax.ShapeDtypeStruct((2, B, H), jnp.float32)),
        grid_spec=pltpu.PrefetchScalarGridSpec(
            num_scalar_prefetch=0,
            grid=(2, n_tc),
            in_specs=[
                pl.BlockSpec((1, tc, B, four_h), lambda d, t: (d, time_block(d, t), 0, 0)),
                pl.BlockSpec((1, H, four_h), lambda d, t: (d, 0, 0)),
                pl.BlockSpec((1, B, H), lambda d, t: (d, 0, 0)),
                pl.BlockSpec((1, B, H), lambda d, t: (d, 0, 0)),
            ],
            out_specs=(
                pl.BlockSpec((1, tc, B, H), lambda d, t: (d, time_block(d, t), 0, 0)),
                pl.BlockSpec((1, B, H), lambda d, t: (d, 0, 0)),
                pl.BlockSpec((1, B, H), lambda d, t: (d, 0, 0)),
            ),
            scratch_shapes=[pltpu.VMEM((B, H), jnp.float32),
                            pltpu.VMEM((B, H), jnp.float32)]),
        compiler_params=pltpu.CompilerParams(
            dimension_semantics=("parallel", "arbitrary"),
            vmem_limit_bytes=_VMEM_LIMIT_BYTES),
    )(gates_x, whh_t, h0, c0)


def fc_project(x, w_t, b):
    """x: (N, 2H), w_t: (2H, V), b: (1, V) -> (N, V), tiled over rows and vocab."""
    N, K = x.shape
    V = w_t.shape[1]
    tn = _pick_tile(N, 256, 8)
    tv = _pick_tile(V, 512, 128)
    return pl.pallas_call(
        _fc_kernel,
        out_shape=jax.ShapeDtypeStruct((N, V), jnp.float32),
        grid_spec=pltpu.PrefetchScalarGridSpec(
            num_scalar_prefetch=0,
            grid=(N // tn, V // tv),
            in_specs=[pl.BlockSpec((tn, K), lambda i, j: (i, 0)),
                      pl.BlockSpec((K, tv), lambda i, j: (0, j)),
                      pl.BlockSpec((1, tv), lambda i, j: (0, j))],
            out_specs=pl.BlockSpec((tn, tv), lambda i, j: (i, j))),
        compiler_params=pltpu.CompilerParams(
            dimension_semantics=("parallel", "parallel"),
            vmem_limit_bytes=_VMEM_LIMIT_BYTES),
    )(x, w_t, b)


# ----------------------------------------------------------------------------
# Model: parameters + forward
# ----------------------------------------------------------------------------
def init_params(key, vocab_size, embedding_dim, hidden_size, num_layers):
    """Synthetic parameters matching nn.Embedding / nn.LSTM / nn.Linear shapes.

    Per layer, weights are stacked over direction (index 0 = fwd, 1 = bwd) and stored
    pre-transposed: W_ih^T (2, D_in, 4H), W_hh^T (2, H, 4H), bias = b_ih + b_hh (2, 1, 4H).
    """
    params = {}
    keys = iter(jax.random.split(key, 8 * num_layers + 8))
    H = hidden_size

    params["embedding"] = jax.random.normal(
        next(keys), (vocab_size, embedding_dim), jnp.float32)

    scale = 1.0 / jnp.sqrt(jnp.float32(H))
    for layer in range(num_layers):
        d_in = embedding_dim if layer == 0 else 2 * H
        params[f"wih_t_l{layer}"] = jax.random.uniform(
            next(keys), (2, d_in, 4 * H), jnp.float32, -scale, scale
        ).astype(MATMUL_WEIGHT_DTYPE)
        params[f"whh_t_l{layer}"] = jax.random.uniform(
            next(keys), (2, H, 4 * H), jnp.float32, -scale, scale
        ).astype(MATMUL_WEIGHT_DTYPE)
        params[f"b_l{layer}"] = jax.random.uniform(
            next(keys), (2, 1, 4 * H), jnp.float32, -scale, scale) * 2.0

    scale_fc = 1.0 / jnp.sqrt(jnp.float32(2 * H))
    params["fc_w_t"] = jax.random.uniform(
        next(keys), (2 * H, vocab_size), jnp.float32, -scale_fc, scale_fc
    ).astype(MATMUL_WEIGHT_DTYPE)
    params["fc_b"] = jax.random.uniform(
        next(keys), (1, vocab_size), jnp.float32, -scale_fc, scale_fc)
    return params


@functools.partial(jax.jit, static_argnames=("num_layers",))
def lstm_model_forward(tokens, h0, c0, params, *, num_layers):
    """Equivalent of LSTMModel.forward(x, hidden) in eval mode.

    tokens: (B, T) int32; h0, c0: (num_layers*2, B, H)
    returns logits (B*T, vocab), (h_n, c_n) each (num_layers*2, B, H).
    """
    B, T = tokens.shape
    H = h0.shape[-1]

    emb = jnp.take(params["embedding"], tokens, axis=0)                  # (B, T, E)
    x_slabs = jnp.transpose(emb, (1, 0, 2))[None].astype(jnp.float32)    # (1, T, B, E)

    h_finals, c_finals = [], []
    for layer in range(num_layers):
        gates_x = lstm_input_projection(
            x_slabs, params[f"wih_t_l{layer}"], params[f"b_l{layer}"])
        y, h_n_l, c_n_l = lstm_bidir_recurrence(
            gates_x, params[f"whh_t_l{layer}"],
            h0[2 * layer:2 * layer + 2], c0[2 * layer:2 * layer + 2])
        # Next layer consumes (2, T, B, H) directly (split input weights) -> no concat pass.
        x_slabs = y
        # TODO(synk): nn.LSTM inter-layer dropout (p=0.5) applies only in training mode.
        h_finals.append(h_n_l)
        c_finals.append(c_n_l)

    # (2, T, B, H) -> (B, T, 2, H) -> (B*T, 2H): matches batch_first .contiguous().view(-1, 2H)
    # with feature order [forward | backward]; this single transpose also realizes the concat.
    feats = jnp.transpose(x_slabs, (2, 1, 0, 3)).reshape(B * T, 2 * H)
    logits = fc_project(feats, params["fc_w_t"], params["fc_b"])

    h_n = jnp.concatenate(h_finals, axis=0)
    c_n = jnp.concatenate(c_finals, axis=0)
    return logits, (h_n, c_n)


def init_hidden(num_layers, batch_size, hidden_size):
    shape = (num_layers * 2, batch_size, hidden_size)
    return jnp.zeros(shape, jnp.float32), jnp.zeros(shape, jnp.float32)


# ----------------------------------------------------------------------------
# Pure-JAX reference (lax.scan) for correctness checking
# ----------------------------------------------------------------------------
def _reference_direction(x, wih_t, whh_t, b, h0, c0, reverse):
    H = h0.shape[-1]

    def step(carry, x_t):
        h, c = carry
        gates = x_t @ wih_t + h @ whh_t + b
        i_g = jax.nn.sigmoid(gates[:, 0 * H:1 * H])
        f_g = jax.nn.sigmoid(gates[:, 1 * H:2 * H])
        g_g = jnp.tanh(gates[:, 2 * H:3 * H])
        o_g = jax.nn.sigmoid(gates[:, 3 * H:4 * H])
        c_new = f_g * c + i_g * g_g
        h_new = o_g * jnp.tanh(c_new)
        return (h_new, c_new), h_new

    (hN, cN), ys = jax.lax.scan(step, (h0, c0), x, reverse=reverse)
    return ys, hN, cN


def reference_forward(tokens, h0, c0, params, num_layers):
    B, T = tokens.shape
    H = h0.shape[-1]
    emb = jnp.take(params["embedding"], tokens, axis=0)
    x = jnp.transpose(emb, (1, 0, 2)).astype(jnp.float32)
    hs, cs = [], []
    for layer in range(num_layers):
        wih = params[f"wih_t_l{layer}"].astype(jnp.float32)
        whh = params[f"whh_t_l{layer}"].astype(jnp.float32)
        b = params[f"b_l{layer}"]
        yf, hf, cf = _reference_direction(x, wih[0], whh[0], b[0],
                                          h0[2 * layer], c0[2 * layer], False)
        yb, hb, cb = _reference_direction(x, wih[1], whh[1], b[1],
                                          h0[2 * layer + 1], c0[2 * layer + 1], True)
        x = jnp.concatenate([yf, yb], axis=-1)
        hs += [hf, hb]
        cs += [cf, cb]
    feats = jnp.transpose(x, (1, 0, 2)).reshape(B * T, 2 * H)
    logits = feats @ params["fc_w_t"].astype(jnp.float32) + params["fc_b"]
    return logits, (jnp.stack(hs, 0), jnp.stack(cs, 0))


# ----------------------------------------------------------------------------
# Main
# ----------------------------------------------------------------------------
if __name__ == "__main__":
    vocab_size = 128
    embedding_dim = 32
    hidden_size = 32
    num_layers = 2
    batch = 2
    seq_len = 8

    key = jax.random.PRNGKey(0)
    k_params, k_tokens, k_h, k_c = jax.random.split(key, 4)

    params = init_params(k_params, vocab_size, embedding_dim, hidden_size, num_layers)
    tokens = jax.random.randint(k_tokens, (batch, seq_len), 0, vocab_size, jnp.int32)
    # Non-zero initial hidden state exercises the (layer, direction) state routing.
    h0 = 0.5 * jax.random.normal(k_h, (num_layers * 2, batch, hidden_size), jnp.float32)
    c0 = 0.5 * jax.random.normal(k_c, (num_layers * 2, batch, hidden_size), jnp.float32)

    logits, (h_n, c_n) = lstm_model_forward(tokens, h0, c0, params, num_layers=num_layers)
    jax.block_until_ready((logits, h_n, c_n))

    assert logits.shape == (batch * seq_len, vocab_size)
    assert h_n.shape == (num_layers * 2, batch, hidden_size)
    assert c_n.shape == (num_layers * 2, batch, hidden_size)

    # Correctness check against a pure-JAX (lax.scan) reference of the same forward.
    ref_logits, (ref_h, ref_c) = reference_forward(tokens, h0, c0, params, num_layers)
    assert float(jnp.max(jnp.abs(logits - ref_logits))) < 1e-3
    assert float(jnp.max(jnp.abs(h_n - ref_h))) < 1e-3
    assert float(jnp.max(jnp.abs(c_n - ref_c))) < 1e-3

    print("KERNEL_OK")
</pallas_src>

<mosaic_0001>
module attributes {stable_mosaic.version = 11 : i64} {
  func.func @_input_proj_kernel(%arg0: i32, %arg1: i32, %arg2: memref<2x8x2x32xf32, #tpu.memory_space<vmem>>, %arg3: memref<1x64x128xf32, #tpu.memory_space<vmem>>, %arg4: memref<1x1x128xf32, #tpu.memory_space<vmem>>, %arg5: memref<1x8x2x128xf32, #tpu.memory_space<vmem>>) attributes {dimension_semantics = [#tpu.dimension_semantics<parallel>, #tpu.dimension_semantics<parallel>], iteration_bounds = array<i64: 2, 1>, scalar_prefetch = 0 : i64, scratch_operands = 0 : i64, tpu.core_type = #tpu.core_type<tc>, window_params = [{transform_indices = @transform_0, window_bounds = array<i64: 2, 8, 2, 32>}, {transform_indices = @transform_1, window_bounds = array<i64: 1, 64, 128>}, {transform_indices = @transform_2, window_bounds = array<i64: 1, 1, 128>}, {transform_indices = @transform_3, window_bounds = array<i64: 1, 8, 2, 128>}]} {
    %cst = arith.constant 0.000000e+00 : f32
    %0 = vector.broadcast %cst : f32 to vector<16x128xf32>
    %c0 = arith.constant 0 : index
    %c0_0 = arith.constant 0 : index
    %c0_1 = arith.constant 0 : index
    %c0_2 = arith.constant 0 : index
    %1 = vector.load %arg2[%c0, %c0_0, %c0_1, %c0_2] : memref<2x8x2x32xf32, #tpu.memory_space<vmem>>, vector<1x8x2x32xf32>
    %2 = vector.shape_cast %1 : vector<1x8x2x32xf32> to vector<8x2x32xf32>
    %3 = vector.shape_cast %2 : vector<8x2x32xf32> to vector<16x32xf32>
    %c0_3 = arith.constant 0 : index
    %c0_4 = arith.constant 0 : index
    %c0_5 = arith.constant 0 : index
    %4 = vector.load %arg3[%c0_3, %c0_4, %c0_5] : memref<1x64x128xf32, #tpu.memory_space<vmem>>, vector<1x32x128xf32>
    %5 = vector.shape_cast %4 : vector<1x32x128xf32> to vector<32x128xf32>
    %cst_6 = arith.constant dense<0.000000e+00> : vector<16x128xf32>
    %6 = tpu.matmul %3, %5, %cst_6 {dimension_numbers = #tpu.dot_dimension_numbers<[1], [0], [0], [1], [0, 0, 1, 1], [], []>} : vector<16x32xf32>, vector<32x128xf32>, vector<16x128xf32> -> vector<16x128xf32>
    %7 = arith.addf %0, %6 : vector<16x128xf32>
    %c1 = arith.constant 1 : index
    %c0_7 = arith.constant 0 : index
    %c0_8 = arith.constant 0 : index
    %c0_9 = arith.constant 0 : index
    %8 = vector.load %arg2[%c1, %c0_7, %c0_8, %c0_9] : memref<2x8x2x32xf32, #tpu.memory_space<vmem>>, vector<1x8x2x32xf32>
    %9 = vector.shape_cast %8 : vector<1x8x2x32xf32> to vector<8x2x32xf32>
    %10 = vector.shape_cast %9 : vector<8x2x32xf32> to vector<16x32xf32>
    %c0_10 = arith.constant 0 : index
    %c32 = arith.constant 32 : index
    %c0_11 = arith.constant 0 : index
    %11 = vector.load %arg3[%c0_10, %c32, %c0_11] : memref<1x64x128xf32, #tpu.memory_space<vmem>>, vector<1x32x128xf32>
    %12 = vector.shape_cast %11 : vector<1x32x128xf32> to vector<32x128xf32>
    %cst_12 = arith.constant dense<0.000000e+00> : vector<16x128xf32>
    %13 = tpu.matmul %10, %12, %cst_12 {dimension_numbers = #tpu.dot_dimension_numbers<[1], [0], [0], [1], [0, 0, 1, 1], [], []>} : vector<16x32xf32>, vector<32x128xf32>, vector<16x128xf32> -> vector<16x128xf32>
    %14 = arith.addf %7, %13 : vector<16x128xf32>
    %c0_13 = arith.constant 0 : index
    %c0_14 = arith.constant 0 : index
    %c0_15 = arith.constant 0 : index
    %15 = vector.load %arg4[%c0_13, %c0_14, %c0_15] : memref<1x1x128xf32, #tpu.memory_space<vmem>>, vector<1x1x128xf32>
    %16 = vector.shape_cast %15 : vector<1x1x128xf32> to vector<1x128xf32>
    %17 = vector.broadcast %16 : vector<1x128xf32> to vector<16x128xf32>
    %18 = arith.addf %14, %17 : vector<16x128xf32>
    %19 = vector.shape_cast %18 : vector<16x128xf32> to vector<8x2x128xf32>
    %c0_16 = arith.constant 0 : index
    %c0_17 = arith.constant 0 : index
    %c0_18 = arith.constant 0 : index
    %c0_19 = arith.constant 0 : index
    %20 = vector.load %arg5[%c0_16, %c0_17, %c0_18, %c0_19] : memref<1x8x2x128xf32, #tpu.memory_space<vmem>>, vector<1x8x2x128xf32>
    %21 = vector.shape_cast %20 : vector<1x8x2x128xf32> to vector<8x2x128xf32>
    %22 = vector.shape_cast %19 : vector<8x2x128xf32> to vector<1x8x2x128xf32>
    tpu.vector_store %arg5[%c0_16, %c0_17, %c0_18, %c0_19], %22 {strides = array<i32>} : memref<1x8x2x128xf32, #tpu.memory_space<vmem>>, vector<1x8x2x128xf32>,
    return
  }
  func.func @transform_0(%arg0: i32, %arg1: i32) -> (i32, i32, i32, i32) {
    %c0_i32 = arith.constant 0 : i32
    %c0_i32_0 = arith.constant 0 : i32
    %c0_i32_1 = arith.constant 0 : i32
    %c0_i32_2 = arith.constant 0 : i32
    return %c0_i32, %arg1, %c0_i32_0, %c0_i32_1 : i32, i32, i32, i32
  }
  func.func @transform_1(%arg0: i32, %arg1: i32) -> (i32, i32, i32) {
    %c0_i32 = arith.constant 0 : i32
    %c0_i32_0 = arith.constant 0 : i32
    %c0_i32_1 = arith.constant 0 : i32
    return %arg0, %c0_i32, %c0_i32_0 : i32, i32, i32
  }
  func.func @transform_2(%arg0: i32, %arg1: i32) -> (i32, i32, i32) {
    %c0_i32 = arith.constant 0 : i32
    %c0_i32_0 = arith.constant 0 : i32
    %c0_i32_1 = arith.constant 0 : i32
    return %arg0, %c0_i32, %c0_i32_0 : i32, i32, i32
  }
  func.func @transform_3(%arg0: i32, %arg1: i32) -> (i32, i32, i32, i32) {
    %c0_i32 = arith.constant 0 : i32
    %c0_i32_0 = arith.constant 0 : i32
    %c0_i32_1 = arith.constant 0 : i32
    return %arg0, %arg1, %c0_i32, %c0_i32_0 : i32, i32, i32, i32
  }
}

module attributes {stable_mosaic.version = 11 : i64} {
  func.func @_lstm_recurrence_kernel(%arg0: i32, %arg1: i32, %arg2: memref<1x8x2x128xf32, #tpu.memory_space<vmem>>, %arg3: memref<1x32x128xf32, #tpu.memory_space<vmem>>, %arg4: memref<1x2x32xf32, #tpu.memory_space<vmem>>, %arg5: memref<1x2x32xf32, #tpu.memory_space<vmem>>, %arg6: memref<1x8x2x32xf32, #tpu.memory_space<vmem>>, %arg7: memref<1x2x32xf32, #tpu.memory_space<vmem>>, %arg8: memref<1x2x32xf32, #tpu.memory_space<vmem>>, %arg9: memref<2x32xf32, #tpu.memory_space<vmem>>, %arg10: memref<2x32xf32, #tpu.memory_space<vmem>>) attributes {dimension_semantics = [#tpu.dimension_semantics<parallel>, #tpu.dimension_semantics<arbitrary>], iteration_bounds = array<i64: 2, 1>, scalar_prefetch = 0 : i64, scratch_operands = 2 : i64, tpu.core_type = #tpu.core_type<tc>, window_params = [{transform_indices = @transform_0, window_bounds = array<i64: 1, 8, 2, 128>}, {transform_indices = @transform_1, window_bounds = array<i64: 1, 32, 128>}, {transform_indices = @transform_2, window_bounds = array<i64: 1, 2, 32>}, {transform_indices = @transform_3, window_bounds = array<i64: 1, 2, 32>}, {transform_indices = @transform_4, window_bounds = array<i64: 1, 8, 2, 32>}, {transform_indices = @transform_5, window_bounds = array<i64: 1, 2, 32>}, {transform_indices = @transform_6, window_bounds = array<i64: 1, 2, 32>}]} {
    %c0_i32 = arith.constant 0 : i32
    %0 = arith.cmpi eq, %arg1, %c0_i32 : i32
    %1 = arith.extui %0 : i1 to i32
    %c0_i32_0 = arith.constant 0 : i32
    %2 = arith.cmpi ne, %1, %c0_i32_0 : i32
    scf.if %2 {
      %c0_207 = arith.constant 0 : index
      %c0_208 = arith.constant 0 : index
      %c0_209 = arith.constant 0 : index
      %381 = vector.load %arg4[%c0_207, %c0_208, %c0_209] : memref<1x2x32xf32, #tpu.memory_space<vmem>>, vector<1x2x32xf32>
      %382 = vector.shape_cast %381 : vector<1x2x32xf32> to vector<2x32xf32>
      %c0_210 = arith.constant 0 : index
      %c0_211 = arith.constant 0 : index
      %383 = vector.load %arg9[%c0_210, %c0_211] : memref<2x32xf32, #tpu.memory_space<vmem>>, vector<2x32xf32>
      tpu.vector_store %arg9[%c0_210, %c0_211], %382 {strides = array<i32>} : memref<2x32xf32, #tpu.memory_space<vmem>>, vector<2x32xf32>,
      %c0_212 = arith.constant 0 : index
      %c0_213 = arith.constant 0 : index
      %c0_214 = arith.constant 0 : index
      %384 = vector.load %arg5[%c0_212, %c0_213, %c0_214] : memref<1x2x32xf32, #tpu.memory_space<vmem>>, vector<1x2x32xf32>
      %385 = vector.shape_cast %384 : vector<1x2x32xf32> to vector<2x32xf32>
      %c0_215 = arith.constant 0 : index
      %c0_216 = arith.constant 0 : index
      %386 = vector.load %arg10[%c0_215, %c0_216] : memref<2x32xf32, #tpu.memory_space<vmem>>, vector<2x32xf32>
      tpu.vector_store %arg10[%c0_215, %c0_216], %385 {strides = array<i32>} : memref<2x32xf32, #tpu.memory_space<vmem>>, vector<2x32xf32>,
    } else {
    }
    %c0 = arith.constant 0 : index
    %c0_1 = arith.constant 0 : index
    %c0_2 = arith.constant 0 : index
    %3 = vector.load %arg3[%c0, %c0_1, %c0_2] : memref<1x32x128xf32, #tpu.memory_space<vmem>>, vector<1x32x128xf32>
    %4 = vector.shape_cast %3 : vector<1x32x128xf32> to vector<32x128xf32>
    %c0_i32_3 = arith.constant 0 : i32
    %c0_i32_4 = arith.constant 0 : i32
    %c0_i32_5 = arith.constant 0 : i32
    %c2_i32 = arith.constant 2 : i32
    %5 = arith.muli %c2_i32, %c0_i32_5 : i32
    %c7_i32 = arith.constant 7 : i32
    %6 = arith.subi %c7_i32, %5 : i32
    %7 = arith.muli %arg0, %6 : i32
    %8 = arith.addi %c0_i32_5, %7 : i32
    %c0_i32_6 = arith.constant 0 : i32
    %c0_i32_7 = arith.constant 0 : i32
    %c0_i32_8 = arith.constant 0 : i32
    %9 = tpu.memref_slice %arg2[%c0_i32_3, %c0_i32_6, %c0_i32_7, %c0_i32_8] : memref<1x8x2x128xf32, #tpu.memory_space<vmem>> -> memref<1x8x2x128xf32, #tpu.memory_space<vmem>>
    %10 = tpu.memref_squeeze %9 : memref<1x8x2x128xf32, #tpu.memory_space<vmem>> -> memref<8x2x128xf32, #tpu.memory_space<vmem>>
    %11 = arith.index_cast %8 : i32 to index
    %c0_9 = arith.constant 0 : index
    %c0_10 = arith.constant 0 : index
    %12 = vector.load %10[%11, %c0_9, %c0_10] : memref<8x2x128xf32, #tpu.memory_space<vmem>>, vector<1x2x128xf32>
    %13 = vector.shape_cast %12 : vector<1x2x128xf32> to vector<2x128xf32>
    %c0_11 = arith.constant 0 : index
    %c0_12 = arith.constant 0 : index
    %14 = vector.load %arg9[%c0_11, %c0_12] : memref<2x32xf32, #tpu.memory_space<vmem>>, vector<2x32xf32>
    %c0_13 = arith.constant 0 : index
    %c0_14 = arith.constant 0 : index
    %15 = vector.load %arg10[%c0_13, %c0_14] : memref<2x32xf32, #tpu.memory_space<vmem>>, vector<2x32xf32>
    %cst = arith.constant dense<0.000000e+00> : vector<2x128xf32>
    %16 = tpu.matmul %14, %4, %cst {dimension_numbers = #tpu.dot_dimension_numbers<[1], [0], [0], [1], [0, 0, 1, 1], [], []>} : vector<2x32xf32>, vector<32x128xf32>, vector<2x128xf32> -> vector<2x128xf32>
    %17 = arith.addf %13, %16 : vector<2x128xf32>
    %18 = vector.extract_strided_slice %17 {offsets = [0, 0], sizes = [2, 32], strides = [1, 1]} : vector<2x128xf32> to vector<2x32xf32>
    %19 = arith.negf %18 : vector<2x32xf32>
    %20 = math.exp %19 : vector<2x32xf32>
    %cst_15 = arith.constant 1.000000e+00 : f32
    %21 = vector.broadcast %cst_15 : f32 to vector<2x32xf32>
    %22 = arith.addf %21, %20 : vector<2x32xf32>
    %23 = arith.divf %21, %22 : vector<2x32xf32>
    %24 = vector.extract_strided_slice %17 {offsets = [0, 32], sizes = [2, 32], strides = [1, 1]} : vector<2x128xf32> to vector<2x32xf32>
    %25 = arith.negf %24 : vector<2x32xf32>
    %26 = math.exp %25 : vector<2x32xf32>
    %cst_16 = arith.constant 1.000000e+00 : f32
    %27 = vector.broadcast %cst_16 : f32 to vector<2x32xf32>
    %28 = arith.addf %27, %26 : vector<2x32xf32>
    %29 = arith.divf %27, %28 : vector<2x32xf32>
    %30 = vector.extract_strided_slice %17 {offsets = [0, 64], sizes = [2, 32], strides = [1, 1]} : vector<2x128xf32> to vector<2x32xf32>
    %31 = math.tanh %30 : vector<2x32xf32>
    %32 = vector.extract_strided_slice %17 {offsets = [0, 96], sizes = [2, 32], strides = [1, 1]} : vector<2x128xf32> to vector<2x32xf32>
    %33 = arith.negf %32 : vector<2x32xf32>
    %34 = math.exp %33 : vector<2x32xf32>
    %cst_17 = arith.constant 1.000000e+00 : f32
    %35 = vector.broadcast %cst_17 : f32 to vector<2x32xf32>
    %36 = arith.addf %35, %34 : vector<2x32xf32>
    %37 = arith.divf %35, %36 : vector<2x32xf32>
    %38 = arith.mulf %29, %15 : vector<2x32xf32>
    %39 = arith.mulf %23, %31 : vector<2x32xf32>
    %40 = arith.addf %38, %39 : vector<2x32xf32>
    %41 = math.tanh %40 : vector<2x32xf32>
    %42 = arith.mulf %37, %41 : vector<2x32xf32>
    %c0_18 = arith.constant 0 : index
    %c0_19 = arith.constant 0 : index
    %43 = vector.load %arg9[%c0_18, %c0_19] : memref<2x32xf32, #tpu.memory_space<vmem>>, vector<2x32xf32>
    tpu.vector_store %arg9[%c0_18, %c0_19], %42 {strides = array<i32>} : memref<2x32xf32, #tpu.memory_space<vmem>>, vector<2x32xf32>,
    %c0_20 = arith.constant 0 : index
    %c0_21 = arith.constant 0 : index
    %44 = vector.load %arg10[%c0_20, %c0_21] : memref<2x32xf32, #tpu.memory_space<vmem>>, vector<2x32xf32>
    tpu.vector_store %arg10[%c0_20, %c0_21], %40 {strides = array<i32>} : memref<2x32xf32, #tpu.memory_space<vmem>>, vector<2x32xf32>,
    %c0_i32_22 = arith.constant 0 : i32
    %c0_i32_23 = arith.constant 0 : i32
    %c0_i32_24 = arith.constant 0 : i32
    %45 = tpu.memref_slice %arg6[%c0_i32_4, %c0_i32_22, %c0_i32_23, %c0_i32_24] : memref<1x8x2x32xf32, #tpu.memory_space<vmem>> -> memref<1x8x2x32xf32, #tpu.memory_space<vmem>>
    %46 = tpu.memref_squeeze %45 : memref<1x8x2x32xf32, #tpu.memory_space<vmem>> -> memref<8x2x32xf32, #tpu.memory_space<vmem>>
    %47 = arith.index_cast %8 : i32 to index
    %c0_25 = arith.constant 0 : index
    %c0_26 = arith.constant 0 : index
    %48 = vector.load %46[%47, %c0_25, %c0_26] : memref<8x2x32xf32, #tpu.memory_space<vmem>>, vector<1x2x32xf32>
    %49 = vector.shape_cast %48 : vector<1x2x32xf32> to vector<2x32xf32>
    %50 = vector.shape_cast %42 : vector<2x32xf32> to vector<1x2x32xf32>
    tpu.vector_store %46[%47, %c0_25, %c0_26], %50 {strides = array<i32>} : memref<8x2x32xf32, #tpu.memory_space<vmem>>, vector<1x2x32xf32>,
    %c1_i32 = arith.constant 1 : i32
    %c2_i32_27 = arith.constant 2 : i32
    %51 = arith.muli %c2_i32_27, %c1_i32 : i32
    %c7_i32_28 = arith.constant 7 : i32
    %52 = arith.subi %c7_i32_28, %51 : i32
    %53 = arith.muli %arg0, %52 : i32
    %54 = arith.addi %c1_i32, %53 : i32
    %c0_i32_29 = arith.constant 0 : i32
    %c0_i32_30 = arith.constant 0 : i32
    %c0_i32_31 = arith.constant 0 : i32
    %55 = tpu.memref_slice %arg2[%c0_i32_3, %c0_i32_29, %c0_i32_30, %c0_i32_31] : memref<1x8x2x128xf32, #tpu.memory_space<vmem>> -> memref<1x8x2x128xf32, #tpu.memory_space<vmem>>
    %56 = tpu.memref_squeeze %55 : memref<1x8x2x128xf32, #tpu.memory_space<vmem>> -> memref<8x2x128xf32, #tpu.memory_space<vmem>>
    %57 = arith.index_cast %54 : i32 to index
    %c0_32 = arith.constant 0 : index
    %c0_33 = arith.constant 0 : index
    %58 = vector.load %56[%57, %c0_32, %c0_33] : memref<8x2x128xf32, #tpu.memory_space<vmem>>, vector<1x2x128xf32>
    %59 = vector.shape_cast %58 : vector<1x2x128xf32> to vector<2x128xf32>
    %c0_34 = arith.constant 0 : index
    %c0_35 = arith.constant 0 : index
    %60 = vector.load %arg9[%c0_34, %c0_35] : memref<2x32xf32, #tpu.memory_space<vmem>>, vector<2x32xf32>
    %c0_36 = arith.constant 0 : index
    %c0_37 = arith.constant 0 : index
    %61 = vector.load %arg10[%c0_36, %c0_37] : memref<2x32xf32, #tpu.memory_space<vmem>>, vector<2x32xf32>
    %cst_38 = arith.constant dense<0.000000e+00> : vector<2x128xf32>
    %62 = tpu.matmul %60, %4, %cst_38 {dimension_numbers = #tpu.dot_dimension_numbers<[1], [0], [0], [1], [0, 0, 1, 1], [], []>} : vector<2x32xf32>, vector<32x128xf32>, vector<2x128xf32> -> vector<2x128xf32>
    %63 = arith.addf %59, %62 : vector<2x128xf32>
    %64 = vector.extract_strided_slice %63 {offsets = [0, 0], sizes = [2, 32], strides = [1, 1]} : vector<2x128xf32> to vector<2x32xf32>
    %65 = arith.negf %64 : vector<2x32xf32>
    %66 = math.exp %65 : vector<2x32xf32>
    %cst_39 = arith.constant 1.000000e+00 : f32
    %67 = vector.broadcast %cst_39 : f32 to vector<2x32xf32>
    %68 = arith.addf %67, %66 : vector<2x32xf32>
    %69 = arith.divf %67, %68 : vector<2x32xf32>
    %70 = vector.extract_strided_slice %63 {offsets = [0, 32], sizes = [2, 32], strides = [1, 1]} : vector<2x128xf32> to vector<2x32xf32>
    %71 = arith.negf %70 : vector<2x32xf32>
    %72 = math.exp %71 : vector<2x32xf32>
    %cst_40 = arith.constant 1.000000e+00 : f32
    %73 = vector.broadcast %cst_40 : f32 to vector<2x32xf32>
    %74 = arith.addf %73, %72 : vector<2x32xf32>
    %75 = arith.divf %73, %74 : vector<2x32xf32>
    %76 = vector.extract_strided_slice %63 {offsets = [0, 64], sizes = [2, 32], strides = [1, 1]} : vector<2x128xf32> to vector<2x32xf32>
    %77 = math.tanh %76 : vector<2x32xf32>
    %78 = vector.extract_strided_slice %63 {offsets = [0, 96], sizes = [2, 32], strides = [1, 1]} : vector<2x128xf32> to vector<2x32xf32>
    %79 = arith.negf %78 : vector<2x32xf32>
    %80 = math.exp %79 : vector<2x32xf32>
    %cst_41 = arith.constant 1.000000e+00 : f32
    %81 = vector.broadcast %cst_41 : f32 to vector<2x32xf32>
    %82 = arith.addf %81, %80 : vector<2x32xf32>
    %83 = arith.divf %81, %82 : vector<2x32xf32>
    %84 = arith.mulf %75, %61 : vector<2x32xf32>
    %85 = arith.mulf %69, %77 : vector<2x32xf32>
    %86 = arith.addf %84, %85 : vector<2x32xf32>
    %87 = math.tanh %86 : vector<2x32xf32>
    %88 = arith.mulf %83, %87 : vector<2x32xf32>
    %c0_42 = arith.constant 0 : index
    %c0_43 = arith.constant 0 : index
    %89 = vector.load %arg9[%c0_42, %c0_43] : memref<2x32xf32, #tpu.memory_space<vmem>>, vector<2x32xf32>
    tpu.vector_store %arg9[%c0_42, %c0_43], %88 {strides = array<i32>} : memref<2x32xf32, #tpu.memory_space<vmem>>, vector<2x32xf32>,
    %c0_44 = arith.constant 0 : index
    %c0_45 = arith.constant 0 : index
    %90 = vector.load %arg10[%c0_44, %c0_45] : memref<2x32xf32, #tpu.memory_space<vmem>>, vector<2x32xf32>
    tpu.vector_store %arg10[%c0_44, %c0_45], %86 {strides = array<i32>} : memref<2x32xf32, #tpu.memory_space<vmem>>, vector<2x32xf32>,
    %c0_i32_46 = arith.constant 0 : i32
    %c0_i32_47 = arith.constant 0 : i32
    %c0_i32_48 = arith.constant 0 : i32
    %91 = tpu.memref_slice %arg6[%c0_i32_4, %c0_i32_46, %c0_i32_47, %c0_i32_48] : memref<1x8x2x32xf32, #tpu.memory_space<vmem>> -> memref<1x8x2x32xf32, #tpu.memory_space<vmem>>
    %92 = tpu.memref_squeeze %91 : memref<1x8x2x32xf32, #tpu.memory_space<vmem>> -> memref<8x2x32xf32, #tpu.memory_space<vmem>>
    %93 = arith.index_cast %54 : i32 to index
    %c0_49 = arith.constant 0 : index
    %c0_50 = arith.constant 0 : index
    %94 = vector.load %92[%93, %c0_49, %c0_50] : memref<8x2x32xf32, #tpu.memory_space<vmem>>, vector<1x2x32xf32>
    %95 = vector.shape_cast %94 : vector<1x2x32xf32> to vector<2x32xf32>
    %96 = vector.shape_cast %88 : vector<2x32xf32> to vector<1x2x32xf32>
    tpu.vector_store %92[%93, %c0_49, %c0_50], %96 {strides = array<i32>} : memref<8x2x32xf32, #tpu.memory_space<vmem>>, vector<1x2x32xf32>,
    %c2_i32_51 = arith.constant 2 : i32
    %c2_i32_52 = arith.constant 2 : i32
    %97 = arith.muli %c2_i32_52, %c2_i32_51 : i32
    %c7_i32_53 = arith.constant 7 : i32
    %98 = arith.subi %c7_i32_53, %97 : i32
    %99 = arith.muli %arg0, %98 : i32
    %100 = arith.addi %c2_i32_51, %99 : i32
    %c0_i32_54 = arith.constant 0 : i32
    %c0_i32_55 = arith.constant 0 : i32
    %c0_i32_56 = arith.constant 0 : i32
    %101 = tpu.memref_slice %arg2[%c0_i32_3, %c0_i32_54, %c0_i32_55, %c0_i32_56] : memref<1x8x2x128xf32, #tpu.memory_space<vmem>> -> memref<1x8x2x128xf32, #tpu.memory_space<vmem>>
    %102 = tpu.memref_squeeze %101 : memref<1x8x2x128xf32, #tpu.memory_space<vmem>> -> memref<8x2x128xf32, #tpu.memory_space<vmem>>
    %103 = arith.index_cast %100 : i32 to index
    %c0_57 = arith.constant 0 : index
    %c0_58 = arith.constant 0 : index
    %104 = vector.load %102[%103, %c0_57, %c0_58] : memref<8x2x128xf32, #tpu.memory_space<vmem>>, vector<1x2x128xf32>
    %105 = vector.shape_cast %104 : vector<1x2x128xf32> to vector<2x128xf32>
    %c0_59 = arith.constant 0 : index
    %c0_60 = arith.constant 0 : index
    %106 = vector.load %arg9[%c0_59, %c0_60] : memref<2x32xf32, #tpu.memory_space<vmem>>, vector<2x32xf32>
    %c0_61 = arith.constant 0 : index
    %c0_62 = arith.constant 0 : index
    %107 = vector.load %arg10[%c0_61, %c0_62] : memref<2x32xf32, #tpu.memory_space<vmem>>, vector<2x32xf32>
    %cst_63 = arith.constant dense<0.000000e+00> : vector<2x128xf32>
    %108 = tpu.matmul %106, %4, %cst_63 {dimension_numbers = #tpu.dot_dimension_numbers<[1], [0], [0], [1], [0, 0, 1, 1], [], []>} : vector<2x32xf32>, vector<32x128xf32>, vector<2x128xf32> -> vector<2x128xf32>
    %109 = arith.addf %105, %108 : vector<2x128xf32>
    %110 = vector.extract_strided_slice %109 {offsets = [0, 0], sizes = [2, 32], strides = [1, 1]} : vector<2x128xf32> to vector<2x32xf32>
    %111 = arith.negf %110 : vector<2x32xf32>
    %112 = math.exp %111 : vector<2x32xf32>
    %cst_64 = arith.constant 1.000000e+00 : f32
    %113 = vector.broadcast %cst_64 : f32 to vector<2x32xf32>
    %114 = arith.addf %113, %112 : vector<2x32xf32>
    %115 = arith.divf %113, %114 : vector<2x32xf32>
    %116 = vector.extract_strided_slice %109 {offsets = [0, 32], sizes = [2, 32], strides = [1, 1]} : vector<2x128xf32> to vector<2x32xf32>
    %117 = arith.negf %116 : vector<2x32xf32>
    %118 = math.exp %117 : vector<2x32xf32>
    %cst_65 = arith.constant 1.000000e+00 : f32
    %119 = vector.broadcast %cst_65 : f32 to vector<2x32xf32>
    %120 = arith.addf %119, %118 : vector<2x32xf32>
    %121 = arith.divf %119, %120 : vector<2x32xf32>
    %122 = vector.extract_strided_slice %109 {offsets = [0, 64], sizes = [2, 32], strides = [1, 1]} : vector<2x128xf32> to vector<2x32xf32>
    %123 = math.tanh %122 : vector<2x32xf32>
    %124 = vector.extract_strided_slice %109 {offsets = [0, 96], sizes = [2, 32], strides = [1, 1]} : vector<2x128xf32> to vector<2x32xf32>
    %125 = arith.negf %124 : vector<2x32xf32>
    %126 = math.exp %125 : vector<2x32xf32>
    %cst_66 = arith.constant 1.000000e+00 : f32
    %127 = vector.broadcast %cst_66 : f32 to vector<2x32xf32>
    %128 = arith.addf %127, %126 : vector<2x32xf32>
    %129 = arith.divf %127, %128 : vector<2x32xf32>
    %130 = arith.mulf %121, %107 : vector<2x32xf32>
    %131 = arith.mulf %115, %123 : vector<2x32xf32>
    %132 = arith.addf %130, %131 : vector<2x32xf32>
    %133 = math.tanh %132 : vector<2x32xf32>
    %134 = arith.mulf %129, %133 : vector<2x32xf32>
    %c0_67 = arith.constant 0 : index
    %c0_68 = arith.constant 0 : index
    %135 = vector.load %arg9[%c0_67, %c0_68] : memref<2x32xf32, #tpu.memory_space<vmem>>, vector<2x32xf32>
    tpu.vector_store %arg9[%c0_67, %c0_68], %134 {strides = array<i32>} : memref<2x32xf32, #tpu.memory_space<vmem>>, vector<2x32xf32>,
    %c0_69 = arith.constant 0 : index
    %c0_70 = arith.constant 0 : index
    %136 = vector.load %arg10[%c0_69, %c0_70] : memref<2x32xf32, #tpu.memory_space<vmem>>, vector<2x32xf32>
    tpu.vector_store %arg10[%c0_69, %c0_70], %132 {strides = array<i32>} : memref<2x32xf32, #tpu.memory_space<vmem>>, vector<2x32xf32>,
    %c0_i32_71 = arith.constant 0 : i32
    %c0_i32_72 = arith.constant 0 : i32
    %c0_i32_73 = arith.constant 0 : i32
    %137 = tpu.memref_slice %arg6[%c0_i32_4, %c0_i32_71, %c0_i32_72, %c0_i32_73] : memref<1x8x2x32xf32, #tpu.memory_space<vmem>> -> memref<1x8x2x32xf32, #tpu.memory_space<vmem>>
    %138 = tpu.memref_squeeze %137 : memref<1x8x2x32xf32, #tpu.memory_space<vmem>> -> memref<8x2x32xf32, #tpu.memory_space<vmem>>
    %139 = arith.index_cast %100 : i32 to index
    %c0_74 = arith.constant 0 : index
    %c0_75 = arith.constant 0 : index
    %140 = vector.load %138[%139, %c0_74, %c0_75] : memref<8x2x32xf32, #tpu.memory_space<vmem>>, vector<1x2x32xf32>
    %141 = vector.shape_cast %140 : vector<1x2x32xf32> to vector<2x32xf32>
    %142 = vector.shape_cast %134 : vector<2x32xf32> to vector<1x2x32xf32>
    tpu.vector_store %138[%139, %c0_74, %c0_75], %142 {strides = array<i32>} : memref<8x2x32xf32, #tpu.memory_space<vmem>>, vector<1x2x32xf32>,
    %c3_i32 = arith.constant 3 : i32
    %c2_i32_76 = arith.constant 2 : i32
    %143 = arith.muli %c2_i32_76, %c3_i32 : i32
    %c7_i32_77 = arith.constant 7 : i32
    %144 = arith.subi %c7_i32_77, %143 : i32
    %145 = arith.muli %arg0, %144 : i32
    %146 = arith.addi %c3_i32, %145 : i32
    %c0_i32_78 = arith.constant 0 : i32
    %c0_i32_79 = arith.constant 0 : i32
    %c0_i32_80 = arith.constant 0 : i32
    %147 = tpu.memref_slice %arg2[%c0_i32_3, %c0_i32_78, %c0_i32_79, %c0_i32_80] : memref<1x8x2x128xf32, #tpu.memory_space<vmem>> -> memref<1x8x2x128xf32, #tpu.memory_space<vmem>>
    %148 = tpu.memref_squeeze %147 : memref<1x8x2x128xf32, #tpu.memory_space<vmem>> -> memref<8x2x128xf32, #tpu.memory_space<vmem>>
    %149 = arith.index_cast %146 : i32 to index
    %c0_81 = arith.constant 0 : index
    %c0_82 = arith.constant 0 : index
    %150 = vector.load %148[%149, %c0_81, %c0_82] : memref<8x2x128xf32, #tpu.memory_space<vmem>>, vector<1x2x128xf32>
    %151 = vector.shape_cast %150 : vector<1x2x128xf32> to vector<2x128xf32>
    %c0_83 = arith.constant 0 : index
    %c0_84 = arith.constant 0 : index
    %152 = vector.load %arg9[%c0_83, %c0_84] : memref<2x32xf32, #tpu.memory_space<vmem>>, vector<2x32xf32>
    %c0_85 = arith.constant 0 : index
    %c0_86 = arith.constant 0 : index
    %153 = vector.load %arg10[%c0_85, %c0_86] : memref<2x32xf32, #tpu.memory_space<vmem>>, vector<2x32xf32>
    %cst_87 = arith.constant dense<0.000000e+00> : vector<2x128xf32>
    %154 = tpu.matmul %152, %4, %cst_87 {dimension_numbers = #tpu.dot_dimension_numbers<[1], [0], [0], [1], [0, 0, 1, 1], [], []>} : vector<2x32xf32>, vector<32x128xf32>, vector<2x128xf32> -> vector<2x128xf32>
    %155 = arith.addf %151, %154 : vector<2x128xf32>
    %156 = vector.extract_strided_slice %155 {offsets = [0, 0], sizes = [2, 32], strides = [1, 1]} : vector<2x128xf32> to vector<2x32xf32>
    %157 = arith.negf %156 : vector<2x32xf32>
    %158 = math.exp %157 : vector<2x32xf32>
    %cst_88 = arith.constant 1.000000e+00 : f32
    %159 = vector.broadcast %cst_88 : f32 to vector<2x32xf32>
    %160 = arith.addf %159, %158 : vector<2x32xf32>
    %161 = arith.divf %159, %160 : vector<2x32xf32>
    %162 = vector.extract_strided_slice %155 {offsets = [0, 32], sizes = [2, 32], strides = [1, 1]} : vector<2x128xf32> to vector<2x32xf32>
    %163 = arith.negf %162 : vector<2x32xf32>
    %164 = math.exp %163 : vector<2x32xf32>
    %cst_89 = arith.constant 1.000000e+00 : f32
    %165 = vector.broadcast %cst_89 : f32 to vector<2x32xf32>
    %166 = arith.addf %165, %164 : vector<2x32xf32>
    %167 = arith.divf %165, %166 : vector<2x32xf32>
    %168 = vector.extract_strided_slice %155 {offsets = [0, 64], sizes = [2, 32], strides = [1, 1]} : vector<2x128xf32> to vector<2x32xf32>
    %169 = math.tanh %168 : vector<2x32xf32>
    %170 = vector.extract_strided_slice %155 {offsets = [0, 96], sizes = [2, 32], strides = [1, 1]} : vector<2x128xf32> to vector<2x32xf32>
    %171 = arith.negf %170 : vector<2x32xf32>
    %172 = math.exp %171 : vector<2x32xf32>
    %cst_90 = arith.constant 1.000000e+00 : f32
    %173 = vector.broadcast %cst_90 : f32 to vector<2x32xf32>
    %174 = arith.addf %173, %172 : vector<2x32xf32>
    %175 = arith.divf %173, %174 : vector<2x32xf32>
    %176 = arith.mulf %167, %153 : vector<2x32xf32>
    %177 = arith.mulf %161, %169 : vector<2x32xf32>
    %178 = arith.addf %176, %177 : vector<2x32xf32>
    %179 = math.tanh %178 : vector<2x32xf32>
    %180 = arith.mulf %175, %179 : vector<2x32xf32>
    %c0_91 = arith.constant 0 : index
    %c0_92 = arith.constant 0 : index
    %181 = vector.load %arg9[%c0_91, %c0_92] : memref<2x32xf32, #tpu.memory_space<vmem>>, vector<2x32xf32>
    tpu.vector_store %arg9[%c0_91, %c0_92], %180 {strides = array<i32>} : memref<2x32xf32, #tpu.memory_space<vmem>>, vector<2x32xf32>,
    %c0_93 = arith.constant 0 : index
    %c0_94 = arith.constant 0 : index
    %182 = vector.load %arg10[%c0_93, %c0_94] : memref<2x32xf32, #tpu.memory_space<vmem>>, vector<2x32xf32>
    tpu.vector_store %arg10[%c0_93, %c0_94], %178 {strides = array<i32>} : memref<2x32xf32, #tpu.memory_space<vmem>>, vector<2x32xf32>,
    %c0_i32_95 = arith.constant 0 : i32
    %c0_i32_96 = arith.constant 0 : i32
    %c0_i32_97 = arith.constant 0 : i32
    %183 = tpu.memref_slice %arg6[%c0_i32_4, %c0_i32_95, %c0_i32_96, %c0_i32_97] : memref<1x8x2x32xf32, #tpu.memory_space<vmem>> -> memref<1x8x2x32xf32, #tpu.memory_space<vmem>>
    %184 = tpu.memref_squeeze %183 : memref<1x8x2x32xf32, #tpu.memory_space<vmem>> -> memref<8x2x32xf32, #tpu.memory_space<vmem>>
    %185 = arith.index_cast %146 : i32 to index
    %c0_98 = arith.constant 0 : index
    %c0_99 = arith.constant 0 : index
    %186 = vector.load %184[%185, %c0_98, %c0_99] : memref<8x2x32xf32, #tpu.memory_space<vmem>>, vector<1x2x32xf32>
    %187 = vector.shape_cast %186 : vector<1x2x32xf32> to vector<2x32xf32>
    %188 = vector.shape_cast %180 : vector<2x32xf32> to vector<1x2x32xf32>
    tpu.vector_store %184[%185, %c0_98, %c0_99], %188 {strides = array<i32>} : memref<8x2x32xf32, #tpu.memory_space<vmem>>, vector<1x2x32xf32>,
    %c4_i32 = arith.constant 4 : i32
    %c2_i32_100 = arith.constant 2 : i32
    %189 = arith.muli %c2_i32_100, %c4_i32 : i32
    %c7_i32_101 = arith.constant 7 : i32
    %190 = arith.subi %c7_i32_101, %189 : i32
    %191 = arith.muli %arg0, %190 : i32
    %192 = arith.addi %c4_i32, %191 : i32
    %c0_i32_102 = arith.constant 0 : i32
    %c0_i32_103 = arith.constant 0 : i32
    %c0_i32_104 = arith.constant 0 : i32
    %193 = tpu.memref_slice %arg2[%c0_i32_3, %c0_i32_102, %c0_i32_103, %c0_i32_104] : memref<1x8x2x128xf32, #tpu.memory_space<vmem>> -> memref<1x8x2x128xf32, #tpu.memory_space<vmem>>
    %194 = tpu.memref_squeeze %193 : memref<1x8x2x128xf32, #tpu.memory_space<vmem>> -> memref<8x2x128xf32, #tpu.memory_space<vmem>>
    %195 = arith.index_cast %192 : i32 to index
    %c0_105 = arith.constant 0 : index
    %c0_106 = arith.constant 0 : index
    %196 = vector.load %194[%195, %c0_105, %c0_106] : memref<8x2x128xf32, #tpu.memory_space<vmem>>, vector<1x2x128xf32>
    %197 = vector.shape_cast %196 : vector<1x2x128xf32> to vector<2x128xf32>
    %c0_107 = arith.constant 0 : index
    %c0_108 = arith.constant 0 : index
    %198 = vector.load %arg9[%c0_107, %c0_108] : memref<2x32xf32, #tpu.memory_space<vmem>>, vector<2x32xf32>
    %c0_109 = arith.constant 0 : index
    %c0_110 = arith.constant 0 : index
    %199 = vector.load %arg10[%c0_109, %c0_110] : memref<2x32xf32, #tpu.memory_space<vmem>>, vector<2x32xf32>
    %cst_111 = arith.constant dense<0.000000e+00> : vector<2x128xf32>
    %200 = tpu.matmul %198, %4, %cst_111 {dimension_numbers = #tpu.dot_dimension_numbers<[1], [0], [0], [1], [0, 0, 1, 1], [], []>} : vector<2x32xf32>, vector<32x128xf32>, vector<2x128xf32> -> vector<2x128xf32>
    %201 = arith.addf %197, %200 : vector<2x128xf32>
    %202 = vector.extract_strided_slice %201 {offsets = [0, 0], sizes = [2, 32], strides = [1, 1]} : vector<2x128xf32> to vector<2x32xf32>
    %203 = arith.negf %202 : vector<2x32xf32>
    %204 = math.exp %203 : vector<2x32xf32>
    %cst_112 = arith.constant 1.000000e+00 : f32
    %205 = vector.broadcast %cst_112 : f32 to vector<2x32xf32>
    %206 = arith.addf %205, %204 : vector<2x32xf32>
    %207 = arith.divf %205, %206 : vector<2x32xf32>
    %208 = vector.extract_strided_slice %201 {offsets = [0, 32], sizes = [2, 32], strides = [1, 1]} : vector<2x128xf32> to vector<2x32xf32>
    %209 = arith.negf %208 : vector<2x32xf32>
    %210 = math.exp %209 : vector<2x32xf32>
    %cst_113 = arith.constant 1.000000e+00 : f32
    %211 = vector.broadcast %cst_113 : f32 to vector<2x32xf32>
    %212 = arith.addf %211, %210 : vector<2x32xf32>
    %213 = arith.divf %211, %212 : vector<2x32xf32>
    %214 = vector.extract_strided_slice %201 {offsets = [0, 64], sizes = [2, 32], strides = [1, 1]} : vector<2x128xf32> to vector<2x32xf32>
    %215 = math.tanh %214 : vector<2x32xf32>
    %216 = vector.extract_strided_slice %201 {offsets = [0, 96], sizes = [2, 32], strides = [1, 1]} : vector<2x128xf32> to vector<2x32xf32>
    %217 = arith.negf %216 : vector<2x32xf32>
    %218 = math.exp %217 : vector<2x32xf32>
    %cst_114 = arith.constant 1.000000e+00 : f32
    %219 = vector.broadcast %cst_114 : f32 to vector<2x32xf32>
    %220 = arith.addf %219, %218 : vector<2x32xf32>
    %221 = arith.divf %219, %220 : vector<2x32xf32>
    %222 = arith.mulf %213, %199 : vector<2x32xf32>
    %223 = arith.mulf %207, %215 : vector<2x32xf32>
    %224 = arith.addf %222, %223 : vector<2x32xf32>
    %225 = math.tanh %224 : vector<2x32xf32>
    %226 = arith.mulf %221, %225 : vector<2x32xf32>
    %c0_115 = arith.constant 0 : index
    %c0_116 = arith.constant 0 : index
    %227 = vector.load %arg9[%c0_115, %c0_116] : memref<2x32xf32, #tpu.memory_space<vmem>>, vector<2x32xf32>
    tpu.vector_store %arg9[%c0_115, %c0_116], %226 {strides = array<i32>} : memref<2x32xf32, #tpu.memory_space<vmem>>, vector<2x32xf32>,
    %c0_117 = arith.constant 0 : index
    %c0_118 = arith.constant 0 : index
    %228 = vector.load %arg10[%c0_117, %c0_118] : memref<2x32xf32, #tpu.memory_space<vmem>>, vector<2x32xf32>
    tpu.vector_store %arg10[%c0_117, %c0_118], %224 {strides = array<i32>} : memref<2x32xf32, #tpu.memory_space<vmem>>, vector<2x32xf32>,
    %c0_i32_119 = arith.constant 0 : i32
    %c0_i32_120 = arith.constant 0 : i32
    %c0_i32_121 = arith.constant 0 : i32
    %229 = tpu.memref_slice %arg6[%c0_i32_4, %c0_i32_119, %c0_i32_120, %c0_i32_121] : memref<1x8x2x32xf32, #tpu.memory_space<vmem>> -> memref<1x8x2x32xf32, #tpu.memory_space<vmem>>
    %230 = tpu.memref_squeeze %229 : memref<1x8x2x32xf32, #tpu.memory_space<vmem>> -> memref<8x2x32xf32, #tpu.memory_space<vmem>>
    %231 = arith.index_cast %192 : i32 to index
    %c0_122 = arith.constant 0 : index
    %c0_123 = arith.constant 0 : index
    %232 = vector.load %230[%231, %c0_122, %c0_123] : memref<8x2x32xf32, #tpu.memory_space<vmem>>, vector<1x2x32xf32>
    %233 = vector.shape_cast %232 : vector<1x2x32xf32> to vector<2x32xf32>
    %234 = vector.shape_cast %226 : vector<2x32xf32> to vector<1x2x32xf32>
    tpu.vector_store %230[%231, %c0_122, %c0_123], %234 {strides = array<i32>} : memref<8x2x32xf32, #tpu.memory_space<vmem>>, vector<1x2x32xf32>,
    %c5_i32 = arith.constant 5 : i32
    %c2_i32_124 = arith.constant 2 : i32
    %235 = arith.muli %c2_i32_124, %c5_i32 : i32
    %c7_i32_125 = arith.constant 7 : i32
    %236 = arith.subi %c7_i32_125, %235 : i32
    %237 = arith.muli %arg0, %236 : i32
    %238 = arith.addi %c5_i32, %237 : i32
    %c0_i32_126 = arith.constant 0 : i32
    %c0_i32_127 = arith.constant 0 : i32
    %c0_i32_128 = arith.constant 0 : i32
    %239 = tpu.memref_slice %arg2[%c0_i32_3, %c0_i32_126, %c0_i32_127, %c0_i32_128] : memref<1x8x2x128xf32, #tpu.memory_space<vmem>> -> memref<1x8x2x128xf32, #tpu.memory_space<vmem>>
    %240 = tpu.memref_squeeze %239 : memref<1x8x2x128xf32, #tpu.memory_space<vmem>> -> memref<8x2x128xf32, #tpu.memory_space<vmem>>
    %241 = arith.index_cast %238 : i32 to index
    %c0_129 = arith.constant 0 : index
    %c0_130 = arith.constant 0 : index
    %242 = vector.load %240[%241, %c0_129, %c0_130] : memref<8x2x128xf32, #tpu.memory_space<vmem>>, vector<1x2x128xf32>
    %243 = vector.shape_cast %242 : vector<1x2x128xf32> to vector<2x128xf32>
    %c0_131 = arith.constant 0 : index
    %c0_132 = arith.constant 0 : index
    %244 = vector.load %arg9[%c0_131, %c0_132] : memref<2x32xf32, #tpu.memory_space<vmem>>, vector<2x32xf32>
    %c0_133 = arith.constant 0 : index
    %c0_134 = arith.constant 0 : index
    %245 = vector.load %arg10[%c0_133, %c0_134] : memref<2x32xf32, #tpu.memory_space<vmem>>, vector<2x32xf32>
    %cst_135 = arith.constant dense<0.000000e+00> : vector<2x128xf32>
    %246 = tpu.matmul %244, %4, %cst_135 {dimension_numbers = #tpu.dot_dimension_numbers<[1], [0], [0], [1], [0, 0, 1, 1], [], []>} : vector<2x32xf32>, vector<32x128xf32>, vector<2x128xf32> -> vector<2x128xf32>
    %247 = arith.addf %243, %246 : vector<2x128xf32>
    %248 = vector.extract_strided_slice %247 {offsets = [0, 0], sizes = [2, 32], strides = [1, 1]} : vector<2x128xf32> to vector<2x32xf32>
    %249 = arith.negf %248 : vector<2x32xf32>
    %250 = math.exp %249 : vector<2x32xf32>
    %cst_136 = arith.constant 1.000000e+00 : f32
    %251 = vector.broadcast %cst_136 : f32 to vector<2x32xf32>
    %252 = arith.addf %251, %250 : vector<2x32xf32>
    %253 = arith.divf %251, %252 : vector<2x32xf32>
    %254 = vector.extract_strided_slice %247 {offsets = [0, 32], sizes = [2, 32], strides = [1, 1]} : vector<2x128xf32> to vector<2x32xf32>
    %255 = arith.negf %254 : vector<2x32xf32>
    %256 = math.exp %255 : vector<2x32xf32>
    %cst_137 = arith.constant 1.000000e+00 : f32
    %257 = vector.broadcast %cst_137 : f32 to vector<2x32xf32>
    %258 = arith.addf %257, %256 : vector<2x32xf32>
    %259 = arith.divf %257, %258 : vector<2x32xf32>
    %260 = vector.extract_strided_slice %247 {offsets = [0, 64], sizes = [2, 32], strides = [1, 1]} : vector<2x128xf32> to vector<2x32xf32>
    %261 = math.tanh %260 : vector<2x32xf32>
    %262 = vector.extract_strided_slice %247 {offsets = [0, 96], sizes = [2, 32], strides = [1, 1]} : vector<2x128xf32> to vector<2x32xf32>
    %263 = arith.negf %262 : vector<2x32xf32>
    %264 = math.exp %263 : vector<2x32xf32>
    %cst_138 = arith.constant 1.000000e+00 : f32
    %265 = vector.broadcast %cst_138 : f32 to vector<2x32xf32>
    %266 = arith.addf %265, %264 : vector<2x32xf32>
    %267 = arith.divf %265, %266 : vector<2x32xf32>
    %268 = arith.mulf %259, %245 : vector<2x32xf32>
    %269 = arith.mulf %253, %261 : vector<2x32xf32>
    %270 = arith.addf %268, %269 : vector<2x32xf32>
    %271 = math.tanh %270 : vector<2x32xf32>
    %272 = arith.mulf %267, %271 : vector<2x32xf32>
    %c0_139 = arith.constant 0 : index
    %c0_140 = arith.constant 0 : index
    %273 = vector.load %arg9[%c0_139, %c0_140] : memref<2x32xf32, #tpu.memory_space<vmem>>, vector<2x32xf32>
    tpu.vector_store %arg9[%c0_139, %c0_140], %272 {strides = array<i32>} : memref<2x32xf32, #tpu.memory_space<vmem>>, vector<2x32xf32>,
    %c0_141 = arith.constant 0 : index
    %c0_142 = arith.constant 0 : index
    %274 = vector.load %arg10[%c0_141, %c0_142] : memref<2x32xf32, #tpu.memory_space<vmem>>, vector<2x32xf32>
    tpu.vector_store %arg10[%c0_141, %c0_142], %270 {strides = array<i32>} : memref<2x32xf32, #tpu.memory_space<vmem>>, vector<2x32xf32>,
    %c0_i32_143 = arith.constant 0 : i32
    %c0_i32_144 = arith.constant 0 : i32
    %c0_i32_145 = arith.constant 0 : i32
    %275 = tpu.memref_slice %arg6[%c0_i32_4, %c0_i32_143, %c0_i32_144, %c0_i32_145] : memref<1x8x2x32xf32, #tpu.memory_space<vmem>> -> memref<1x8x2x32xf32, #tpu.memory_space<vmem>>
    %276 = tpu.memref_squeeze %275 : memref<1x8x2x32xf32, #tpu.memory_space<vmem>> -> memref<8x2x32xf32, #tpu.memory_space<vmem>>
    %277 = arith.index_cast %238 : i32 to index
    %c0_146 = arith.constant 0 : index
    %c0_147 = arith.constant 0 : index
    %278 = vector.load %276[%277, %c0_146, %c0_147] : memref<8x2x32xf32, #tpu.memory_space<vmem>>, vector<1x2x32xf32>
    %279 = vector.shape_cast %278 : vector<1x2x32xf32> to vector<2x32xf32>
    %280 = vector.shape_cast %272 : vector<2x32xf32> to vector<1x2x32xf32>
    tpu.vector_store %276[%277, %c0_146, %c0_147], %280 {strides = array<i32>} : memref<8x2x32xf32, #tpu.memory_space<vmem>>, vector<1x2x32xf32>,
    %c6_i32 = arith.constant 6 : i32
    %c2_i32_148 = arith.constant 2 : i32
    %281 = arith.muli %c2_i32_148, %c6_i32 : i32
    %c7_i32_149 = arith.constant 7 : i32
    %282 = arith.subi %c7_i32_149, %281 : i32
    %283 = arith.muli %arg0, %282 : i32
    %284 = arith.addi %c6_i32, %283 : i32
    %c0_i32_150 = arith.constant 0 : i32
    %c0_i32_151 = arith.constant 0 : i32
    %c0_i32_152 = arith.constant 0 : i32
    %285 = tpu.memref_slice %arg2[%c0_i32_3, %c0_i32_150, %c0_i32_151, %c0_i32_152] : memref<1x8x2x128xf32, #tpu.memory_space<vmem>> -> memref<1x8x2x128xf32, #tpu.memory_space<vmem>>
    %286 = tpu.memref_squeeze %285 : memref<1x8x2x128xf32, #tpu.memory_space<vmem>> -> memref<8x2x128xf32, #tpu.memory_space<vmem>>
    %287 = arith.index_cast %284 : i32 to index
    %c0_153 = arith.constant 0 : index
    %c0_154 = arith.constant 0 : index
    %288 = vector.load %286[%287, %c0_153, %c0_154] : memref<8x2x128xf32, #tpu.memory_space<vmem>>, vector<1x2x128xf32>
    %289 = vector.shape_cast %288 : vector<1x2x128xf32> to vector<2x128xf32>
    %c0_155 = arith.constant 0 : index
    %c0_156 = arith.constant 0 : index
    %290 = vector.load %arg9[%c0_155, %c0_156] : memref<2x32xf32, #tpu.memory_space<vmem>>, vector<2x32xf32>
    %c0_157 = arith.constant 0 : index
    %c0_158 = arith.constant 0 : index
    %291 = vector.load %arg10[%c0_157, %c0_158] : memref<2x32xf32, #tpu.memory_space<vmem>>, vector<2x32xf32>
    %cst_159 = arith.constant dense<0.000000e+00> : vector<2x128xf32>
    %292 = tpu.matmul %290, %4, %cst_159 {dimension_numbers = #tpu.dot_dimension_numbers<[1], [0], [0], [1], [0, 0, 1, 1], [], []>} : vector<2x32xf32>, vector<32x128xf32>, vector<2x128xf32> -> vector<2x128xf32>
    %293 = arith.addf %289, %292 : vector<2x128xf32>
    %294 = vector.extract_strided_slice %293 {offsets = [0, 0], sizes = [2, 32], strides = [1, 1]} : vector<2x128xf32> to vector<2x32xf32>
    %295 = arith.negf %294 : vector<2x32xf32>
    %296 = math.exp %295 : vector<2x32xf32>
    %cst_160 = arith.constant 1.000000e+00 : f32
    %297 = vector.broadcast %cst_160 : f32 to vector<2x32xf32>
    %298 = arith.addf %297, %296 : vector<2x32xf32>
    %299 = arith.divf %297, %298 : vector<2x32xf32>
    %300 = vector.extract_strided_slice %293 {offsets = [0, 32], sizes = [2, 32], strides = [1, 1]} : vector<2x128xf32> to vector<2x32xf32>
    %301 = arith.negf %300 : vector<2x32xf32>
    %302 = math.exp %301 : vector<2x32xf32>
    %cst_161 = arith.constant 1.000000e+00 : f32
    %303 = vector.broadcast %cst_161 : f32 to vector<2x32xf32>
    %304 = arith.addf %303, %302 : vector<2x32xf32>
    %305 = arith.divf %303, %304 : vector<2x32xf32>
    %306 = vector.extract_strided_slice %293 {offsets = [0, 64], sizes = [2, 32], strides = [1, 1]} : vector<2x128xf32> to vector<2x32xf32>
    %307 = math.tanh %306 : vector<2x32xf32>
    %308 = vector.extract_strided_slice %293 {offsets = [0, 96], sizes = [2, 32], strides = [1, 1]} : vector<2x128xf32> to vector<2x32xf32>
    %309 = arith.negf %308 : vector<2x32xf32>
    %310 = math.exp %309 : vector<2x32xf32>
    %cst_162 = arith.constant 1.000000e+00 : f32
    %311 = vector.broadcast %cst_162 : f32 to vector<2x32xf32>
    %312 = arith.addf %311, %310 : vector<2x32xf32>
    %313 = arith.divf %311, %312 : vector<2x32xf32>
    %314 = arith.mulf %305, %291 : vector<2x32xf32>
    %315 = arith.mulf %299, %307 : vector<2x32xf32>
    %316 = arith.addf %314, %315 : vector<2x32xf32>
    %317 = math.tanh %316 : vector<2x32xf32>
    %318 = arith.mulf %313, %317 : vector<2x32xf32>
    %c0_163 = arith.constant 0 : index
    %c0_164 = arith.constant 0 : index
    %319 = vector.load %arg9[%c0_163, %c0_164] : memref<2x32xf32, #tpu.memory_space<vmem>>, vector<2x32xf32>
    tpu.vector_store %arg9[%c0_163, %c0_164], %318 {strides = array<i32>} : memref<2x32xf32, #tpu.memory_space<vmem>>, vector<2x32xf32>,
    %c0_165 = arith.constant 0 : index
    %c0_166 = arith.constant 0 : index
    %320 = vector.load %arg10[%c0_165, %c0_166] : memref<2x32xf32, #tpu.memory_space<vmem>>, vector<2x32xf32>
    tpu.vector_store %arg10[%c0_165, %c0_166], %316 {strides = array<i32>} : memref<2x32xf32, #tpu.memory_space<vmem>>, vector<2x32xf32>,
    %c0_i32_167 = arith.constant 0 : i32
    %c0_i32_168 = arith.constant 0 : i32
    %c0_i32_169 = arith.constant 0 : i32
    %321 = tpu.memref_slice %arg6[%c0_i32_4, %c0_i32_167, %c0_i32_168, %c0_i32_169] : memref<1x8x2x32xf32, #tpu.memory_space<vmem>> -> memref<1x8x2x32xf32, #tpu.memory_space<vmem>>
    %322 = tpu.memref_squeeze %321 : memref<1x8x2x32xf32, #tpu.memory_space<vmem>> -> memref<8x2x32xf32, #tpu.memory_space<vmem>>
    %323 = arith.index_cast %284 : i32 to index
    %c0_170 = arith.constant 0 : index
    %c0_171 = arith.constant 0 : index
    %324 = vector.load %322[%323, %c0_170, %c0_171] : memref<8x2x32xf32, #tpu.memory_space<vmem>>, vector<1x2x32xf32>
    %325 = vector.shape_cast %324 : vector<1x2x32xf32> to vector<2x32xf32>
    %326 = vector.shape_cast %318 : vector<2x32xf32> to vector<1x2x32xf32>
    tpu.vector_store %322[%323, %c0_170, %c0_171], %326 {strides = array<i32>} : memref<8x2x32xf32, #tpu.memory_space<vmem>>, vector<1x2x32xf32>,
    %c7_i32_172 = arith.constant 7 : i32
    %c2_i32_173 = arith.constant 2 : i32
    %327 = arith.muli %c2_i32_173, %c7_i32_172 : i32
    %c7_i32_174 = arith.constant 7 : i32
    %328 = arith.subi %c7_i32_174, %327 : i32
    %329 = arith.muli %arg0, %328 : i32
    %330 = arith.addi %c7_i32_172, %329 : i32
    %c0_i32_175 = arith.constant 0 : i32
    %c0_i32_176 = arith.constant 0 : i32
    %c0_i32_177 = arith.constant 0 : i32
    %331 = tpu.memref_slice %arg2[%c0_i32_3, %c0_i32_175, %c0_i32_176, %c0_i32_177] : memref<1x8x2x128xf32, #tpu.memory_space<vmem>> -> memref<1x8x2x128xf32, #tpu.memory_space<vmem>>
    %332 = tpu.memref_squeeze %331 : memref<1x8x2x128xf32, #tpu.memory_space<vmem>> -> memref<8x2x128xf32, #tpu.memory_space<vmem>>
    %333 = arith.index_cast %330 : i32 to index
    %c0_178 = arith.constant 0 : index
    %c0_179 = arith.constant 0 : index
    %334 = vector.load %332[%333, %c0_178, %c0_179] : memref<8x2x128xf32, #tpu.memory_space<vmem>>, vector<1x2x128xf32>
    %335 = vector.shape_cast %334 : vector<1x2x128xf32> to vector<2x128xf32>
    %c0_180 = arith.constant 0 : index
    %c0_181 = arith.constant 0 : index
    %336 = vector.load %arg9[%c0_180, %c0_181] : memref<2x32xf32, #tpu.memory_space<vmem>>, vector<2x32xf32>
    %c0_182 = arith.constant 0 : index
    %c0_183 = arith.constant 0 : index
    %337 = vector.load %arg10[%c0_182, %c0_183] : memref<2x32xf32, #tpu.memory_space<vmem>>, vector<2x32xf32>
    %cst_184 = arith.constant dense<0.000000e+00> : vector<2x128xf32>
    %338 = tpu.matmul %336, %4, %cst_184 {dimension_numbers = #tpu.dot_dimension_numbers<[1], [0], [0], [1], [0, 0, 1, 1], [], []>} : vector<2x32xf32>, vector<32x128xf32>, vector<2x128xf32> -> vector<2x128xf32>
    %339 = arith.addf %335, %338 : vector<2x128xf32>
    %340 = vector.extract_strided_slice %339 {offsets = [0, 0], sizes = [2, 32], strides = [1, 1]} : vector<2x128xf32> to vector<2x32xf32>
    %341 = arith.negf %340 : vector<2x32xf32>
    %342 = math.exp %341 : vector<2x32xf32>
    %cst_185 = arith.constant 1.000000e+00 : f32
    %343 = vector.broadcast %cst_185 : f32 to vector<2x32xf32>
    %344 = arith.addf %343, %342 : vector<2x32xf32>
    %345 = arith.divf %343, %344 : vector<2x32xf32>
    %346 = vector.extract_strided_slice %339 {offsets = [0, 32], sizes = [2, 32], strides = [1, 1]} : vector<2x128xf32> to vector<2x32xf32>
    %347 = arith.negf %346 : vector<2x32xf32>
    %348 = math.exp %347 : vector<2x32xf32>
    %cst_186 = arith.constant 1.000000e+00 : f32
    %349 = vector.broadcast %cst_186 : f32 to vector<2x32xf32>
    %350 = arith.addf %349, %348 : vector<2x32xf32>
    %351 = arith.divf %349, %350 : vector<2x32xf32>
    %352 = vector.extract_strided_slice %339 {offsets = [0, 64], sizes = [2, 32], strides = [1, 1]} : vector<2x128xf32> to vector<2x32xf32>
    %353 = math.tanh %352 : vector<2x32xf32>
    %354 = vector.extract_strided_slice %339 {offsets = [0, 96], sizes = [2, 32], strides = [1, 1]} : vector<2x128xf32> to vector<2x32xf32>
    %355 = arith.negf %354 : vector<2x32xf32>
    %356 = math.exp %355 : vector<2x32xf32>
    %cst_187 = arith.constant 1.000000e+00 : f32
    %357 = vector.broadcast %cst_187 : f32 to vector<2x32xf32>
    %358 = arith.addf %357, %356 : vector<2x32xf32>
    %359 = arith.divf %357, %358 : vector<2x32xf32>
    %360 = arith.mulf %351, %337 : vector<2x32xf32>
    %361 = arith.mulf %345, %353 : vector<2x32xf32>
    %362 = arith.addf %360, %361 : vector<2x32xf32>
    %363 = math.tanh %362 : vector<2x32xf32>
    %364 = arith.mulf %359, %363 : vector<2x32xf32>
    %c0_188 = arith.constant 0 : index
    %c0_189 = arith.constant 0 : index
    %365 = vector.load %arg9[%c0_188, %c0_189] : memref<2x32xf32, #tpu.memory_space<vmem>>, vector<2x32xf32>
    tpu.vector_store %arg9[%c0_188, %c0_189], %364 {strides = array<i32>} : memref<2x32xf32, #tpu.memory_space<vmem>>, vector<2x32xf32>,
    %c0_190 = arith.constant 0 : index
    %c0_191 = arith.constant 0 : index
    %366 = vector.load %arg10[%c0_190, %c0_191] : memref<2x32xf32, #tpu.memory_space<vmem>>, vector<2x32xf32>
    tpu.vector_store %arg10[%c0_190, %c0_191], %362 {strides = array<i32>} : memref<2x32xf32, #tpu.memory_space<vmem>>, vector<2x32xf32>,
    %c0_i32_192 = arith.constant 0 : i32
    %c0_i32_193 = arith.constant 0 : i32
    %c0_i32_194 = arith.constant 0 : i32
    %367 = tpu.memref_slice %arg6[%c0_i32_4, %c0_i32_192, %c0_i32_193, %c0_i32_194] : memref<1x8x2x32xf32, #tpu.memory_space<vmem>> -> memref<1x8x2x32xf32, #tpu.memory_space<vmem>>
    %368 = tpu.memref_squeeze %367 : memref<1x8x2x32xf32, #tpu.memory_space<vmem>> -> memref<8x2x32xf32, #tpu.memory_space<vmem>>
    %369 = arith.index_cast %330 : i32 to index
    %c0_195 = arith.constant 0 : index
    %c0_196 = arith.constant 0 : index
    %370 = vector.load %368[%369, %c0_195, %c0_196] : memref<8x2x32xf32, #tpu.memory_space<vmem>>, vector<1x2x32xf32>
    %371 = vector.shape_cast %370 : vector<1x2x32xf32> to vector<2x32xf32>
    %372 = vector.shape_cast %364 : vector<2x32xf32> to vector<1x2x32xf32>
    tpu.vector_store %368[%369, %c0_195, %c0_196], %372 {strides = array<i32>} : memref<8x2x32xf32, #tpu.memory_space<vmem>>, vector<1x2x32xf32>,
    %c8_i32 = arith.constant 8 : i32
    %c0_197 = arith.constant 0 : index
    %c0_198 = arith.constant 0 : index
    %373 = vector.load %arg9[%c0_197, %c0_198] : memref<2x32xf32, #tpu.memory_space<vmem>>, vector<2x32xf32>
    %c0_199 = arith.constant 0 : index
    %c0_200 = arith.constant 0 : index
    %c0_201 = arith.constant 0 : index
    %374 = vector.load %arg7[%c0_199, %c0_200, %c0_201] : memref<1x2x32xf32, #tpu.memory_space<vmem>>, vector<1x2x32xf32>
    %375 = vector.shape_cast %374 : vector<1x2x32xf32> to vector<2x32xf32>
    %376 = vector.shape_cast %373 : vector<2x32xf32> to vector<1x2x32xf32>
    tpu.vector_store %arg7[%c0_199, %c0_200, %c0_201], %376 {strides = array<i32>} : memref<1x2x32xf32, #tpu.memory_space<vmem>>, vector<1x2x32xf32>,
    %c0_202 = arith.constant 0 : index
    %c0_203 = arith.constant 0 : index
    %377 = vector.load %arg10[%c0_202, %c0_203] : memref<2x32xf32, #tpu.memory_space<vmem>>, vector<2x32xf32>
    %c0_204 = arith.constant 0 : index
    %c0_205 = arith.constant 0 : index
    %c0_206 = arith.constant 0 : index
    %378 = vector.load %arg8[%c0_204, %c0_205, %c0_206] : memref<1x2x32xf32, #tpu.memory_space<vmem>>, vector<1x2x32xf32>
    %379 = vector.shape_cast %378 : vector<1x2x32xf32> to vector<2x32xf32>
    %380 = vector.shape_cast %377 : vector<2x32xf32> to vector<1x2x32xf32>
    tpu.vector_store %arg8[%c0_204, %c0_205, %c0_206], %380 {strides = array<i32>} : memref<1x2x32xf32, #tpu.memory_space<vmem>>, vector<1x2x32xf32>,
    return
  }
  func.func @transform_0(%arg0: i32, %arg1: i32) -> (i32, i32, i32, i32) {
    %c2_i32 = arith.constant 2 : i32
    %0 = arith.muli %c2_i32, %arg1 : i32
    %c0_i32 = arith.constant 0 : i32
    %1 = arith.subi %c0_i32, %0 : i32
    %2 = arith.muli %arg0, %1 : i32
    %3 = arith.addi %arg1, %2 : i32
    %c0_i32_0 = arith.constant 0 : i32
    %c0_i32_1 = arith.constant 0 : i32
    %c0_i32_2 = arith.constant 0 : i32
    return %arg0, %3, %c0_i32_0, %c0_i32_1 : i32, i32, i32, i32
  }
  func.func @transform_1(%arg0: i32, %arg1: i32) -> (i32, i32, i32) {
    %c0_i32 = arith.constant 0 : i32
    %c0_i32_0 = arith.constant 0 : i32
    %c0_i32_1 = arith.constant 0 : i32
    return %arg0, %c0_i32, %c0_i32_0 : i32, i32, i32
  }
  func.func @transform_2(%arg0: i32, %arg1: i32) -> (i32, i32, i32) {
    %c0_i32 = arith.constant 0 : i32
    %c0_i32_0 = arith.constant 0 : i32
    %c0_i32_1 = arith.constant 0 : i32
    return %arg0, %c0_i32, %c0_i32_0 : i32, i32, i32
  }
  func.func @transform_3(%arg0: i32, %arg1: i32) -> (i32, i32, i32) {
    %c0_i32 = arith.constant 0 : i32
    %c0_i32_0 = arith.constant 0 : i32
    %c0_i32_1 = arith.constant 0 : i32
    return %arg0, %c0_i32, %c0_i32_0 : i32, i32, i32
  }
  func.func @transform_4(%arg0: i32, %arg1: i32) -> (i32, i32, i32, i32) {
    %c2_i32 = arith.constant 2 : i32
    %0 = arith.muli %c2_i32, %arg1 : i32
    %c0_i32 = arith.constant 0 : i32
    %1 = arith.subi %c0_i32, %0 : i32
    %2 = arith.muli %arg0, %1 : i32
    %3 = arith.addi %arg1, %2 : i32
    %c0_i32_0 = arith.constant 0 : i32
    %c0_i32_1 = arith.constant 0 : i32
    %c0_i32_2 = arith.constant 0 : i32
    return %arg0, %3, %c0_i32_0, %c0_i32_1 : i32, i32, i32, i32
  }
  func.func @transform_5(%arg0: i32, %arg1: i32) -> (i32, i32, i32) {
    %c0_i32 = arith.constant 0 : i32
    %c0_i32_0 = arith.constant 0 : i32
    %c0_i32_1 = arith.constant 0 : i32
    return %arg0, %c0_i32, %c0_i32_0 : i32, i32, i32
  }
  func.func @transform_6(%arg0: i32, %arg1: i32) -> (i32, i32, i32) {
    %c0_i32 = arith.constant 0 : i32
    %c0_i32_0 = arith.constant 0 : i32
    %c0_i32_1 = arith.constant 0 : i32
    return %arg0, %c0_i32, %c0_i32_0 : i32, i32, i32
  }
}

module attributes {stable_mosaic.version = 11 : i64} {
  func.func @_input_proj_kernel(%arg0: i32, %arg1: i32, %arg2: memref<1x8x2x32xf32, #tpu.memory_space<vmem>>, %arg3: memref<1x32x128xf32, #tpu.memory_space<vmem>>, %arg4: memref<1x1x128xf32, #tpu.memory_space<vmem>>, %arg5: memref<1x8x2x128xf32, #tpu.memory_space<vmem>>) attributes {dimension_semantics = [#tpu.dimension_semantics<parallel>, #tpu.dimension_semantics<parallel>], iteration_bounds = array<i64: 2, 1>, scalar_prefetch = 0 : i64, scratch_operands = 0 : i64, tpu.core_type = #tpu.core_type<tc>, window_params = [{transform_indices = @transform_0, window_bounds = array<i64: 1, 8, 2, 32>}, {transform_indices = @transform_1, window_bounds = array<i64: 1, 32, 128>}, {transform_indices = @transform_2, window_bounds = array<i64: 1, 1, 128>}, {transform_indices = @transform_3, window_bounds = array<i64: 1, 8, 2, 128>}]} {
    %cst = arith.constant 0.000000e+00 : f32
    %0 = vector.broadcast %cst : f32 to vector<16x128xf32>
    %c0 = arith.constant 0 : index
    %c0_0 = arith.constant 0 : index
    %c0_1 = arith.constant 0 : index
    %c0_2 = arith.constant 0 : index
    %1 = vector.load %arg2[%c0, %c0_0, %c0_1, %c0_2] : memref<1x8x2x32xf32, #tpu.memory_space<vmem>>, vector<1x8x2x32xf32>
    %2 = vector.shape_cast %1 : vector<1x8x2x32xf32> to vector<8x2x32xf32>
    %3 = vector.shape_cast %2 : vector<8x2x32xf32> to vector<16x32xf32>
    %c0_3 = arith.constant 0 : index
    %c0_4 = arith.constant 0 : index
    %c0_5 = arith.constant 0 : index
    %4 = vector.load %arg3[%c0_3, %c0_4, %c0_5] : memref<1x32x128xf32, #tpu.memory_space<vmem>>, vector<1x32x128xf32>
    %5 = vector.shape_cast %4 : vector<1x32x128xf32> to vector<32x128xf32>
    %cst_6 = arith.constant dense<0.000000e+00> : vector<16x128xf32>
    %6 = tpu.matmul %3, %5, %cst_6 {dimension_numbers = #tpu.dot_dimension_numbers<[1], [0], [0], [1], [0, 0, 1, 1], [], []>} : vector<16x32xf32>, vector<32x128xf32>, vector<16x128xf32> -> vector<16x128xf32>
    %7 = arith.addf %0, %6 : vector<16x128xf32>
    %c0_7 = arith.constant 0 : index
    %c0_8 = arith.constant 0 : index
    %c0_9 = arith.constant 0 : index
    %8 = vector.load %arg4[%c0_7, %c0_8, %c0_9] : memref<1x1x128xf32, #tpu.memory_space<vmem>>, vector<1x1x128xf32>
    %9 = vector.shape_cast %8 : vector<1x1x128xf32> to vector<1x128xf32>
    %10 = vector.broadcast %9 : vector<1x128xf32> to vector<16x128xf32>
    %11 = arith.addf %7, %10 : vector<16x128xf32>
    %12 = vector.shape_cast %11 : vector<16x128xf32> to vector<8x2x128xf32>
    %c0_10 = arith.constant 0 : index
    %c0_11 = arith.constant 0 : index
    %c0_12 = arith.constant 0 : index
    %c0_13 = arith.constant 0 : index
    %13 = vector.load %arg5[%c0_10, %c0_11, %c0_12, %c0_13] : memref<1x8x2x128xf32, #tpu.memory_space<vmem>>, vector<1x8x2x128xf32>
    %14 = vector.shape_cast %13 : vector<1x8x2x128xf32> to vector<8x2x128xf32>
    %15 = vector.shape_cast %12 : vector<8x2x128xf32> to vector<1x8x2x128xf32>
    tpu.vector_store %arg5[%c0_10, %c0_11, %c0_12, %c0_13], %15 {strides = array<i32>} : memref<1x8x2x128xf32, #tpu.memory_space<vmem>>, vector<1x8x2x128xf32>,
    return
  }
  func.func @transform_0(%arg0: i32, %arg1: i32) -> (i32, i32, i32, i32) {
    %c0_i32 = arith.constant 0 : i32
    %c0_i32_0 = arith.constant 0 : i32
    %c0_i32_1 = arith.constant 0 : i32
    %c0_i32_2 = arith.constant 0 : i32
    return %c0_i32, %arg1, %c0_i32_0, %c0_i32_1 : i32, i32, i32, i32
  }
  func.func @transform_1(%arg0: i32, %arg1: i32) -> (i32, i32, i32) {
    %c0_i32 = arith.constant 0 : i32
    %c0_i32_0 = arith.constant 0 : i32
    %c0_i32_1 = arith.constant 0 : i32
    return %arg0, %c0_i32, %c0_i32_0 : i32, i32, i32
  }
  func.func @transform_2(%arg0: i32, %arg1: i32) -> (i32, i32, i32) {
    %c0_i32 = arith.constant 0 : i32
    %c0_i32_0 = arith.constant 0 : i32
    %c0_i32_1 = arith.constant 0 : i32
    return %arg0, %c0_i32, %c0_i32_0 : i32, i32, i32
  }
  func.func @transform_3(%arg0: i32, %arg1: i32) -> (i32, i32, i32, i32) {
    %c0_i32 = arith.constant 0 : i32
    %c0_i32_0 = arith.constant 0 : i32
    %c0_i32_1 = arith.constant 0 : i32
    return %arg0, %arg1, %c0_i32, %c0_i32_0 : i32, i32, i32, i32
  }
}

module attributes {stable_mosaic.version = 11 : i64} {
  func.func @_fc_kernel(%arg0: i32, %arg1: i32, %arg2: memref<16x64xf32, #tpu.memory_space<vmem>>, %arg3: memref<64x128xf32, #tpu.memory_space<vmem>>, %arg4: memref<1x128xf32, #tpu.memory_space<vmem>>, %arg5: memref<16x128xf32, #tpu.memory_space<vmem>>) attributes {dimension_semantics = [#tpu.dimension_semantics<parallel>, #tpu.dimension_semantics<parallel>], iteration_bounds = array<i64: 1, 1>, scalar_prefetch = 0 : i64, scratch_operands = 0 : i64, tpu.core_type = #tpu.core_type<tc>, window_params = [{transform_indices = @transform_0, window_bounds = array<i64: 16, 64>}, {transform_indices = @transform_1, window_bounds = array<i64: 64, 128>}, {transform_indices = @transform_2, window_bounds = array<i64: 1, 128>}, {transform_indices = @transform_3, window_bounds = array<i64: 16, 128>}]} {
    %c0 = arith.constant 0 : index
    %c0_0 = arith.constant 0 : index
    %0 = vector.load %arg2[%c0, %c0_0] : memref<16x64xf32, #tpu.memory_space<vmem>>, vector<16x64xf32>
    %c0_1 = arith.constant 0 : index
    %c0_2 = arith.constant 0 : index
    %1 = vector.load %arg3[%c0_1, %c0_2] : memref<64x128xf32, #tpu.memory_space<vmem>>, vector<64x128xf32>
    %cst = arith.constant dense<0.000000e+00> : vector<16x128xf32>
    %2 = tpu.matmul %0, %1, %cst {dimension_numbers = #tpu.dot_dimension_numbers<[1], [0], [0], [1], [0, 0, 1, 1], [], []>} : vector<16x64xf32>, vector<64x128xf32>, vector<16x128xf32> -> vector<16x128xf32>
    %c0_3 = arith.constant 0 : index
    %c0_4 = arith.constant 0 : index
    %3 = vector.load %arg4[%c0_3, %c0_4] : memref<1x128xf32, #tpu.memory_space<vmem>>, vector<1x128xf32>
    %4 = vector.broadcast %3 : vector<1x128xf32> to vector<16x128xf32>
    %5 = arith.addf %2, %4 : vector<16x128xf32>
    %c0_5 = arith.constant 0 : index
    %c0_6 = arith.constant 0 : index
    %6 = vector.load %arg5[%c0_5, %c0_6] : memref<16x128xf32, #tpu.memory_space<vmem>>, vector<16x128xf32>
    tpu.vector_store %arg5[%c0_5, %c0_6], %5 {strides = array<i32>} : memref<16x128xf32, #tpu.memory_space<vmem>>, vector<16x128xf32>,
    return
  }
  func.func @transform_0(%arg0: i32, %arg1: i32) -> (i32, i32) {
    %c0_i32 = arith.constant 0 : i32
    %c0_i32_0 = arith.constant 0 : i32
    return %arg0, %c0_i32 : i32, i32
  }
  func.func @transform_1(%arg0: i32, %arg1: i32) -> (i32, i32) {
    %c0_i32 = arith.constant 0 : i32
    %c0_i32_0 = arith.constant 0 : i32
    return %c0_i32, %arg1 : i32, i32
  }
  func.func @transform_2(%arg0: i32, %arg1: i32) -> (i32, i32) {
    %c0_i32 = arith.constant 0 : i32
    %c0_i32_0 = arith.constant 0 : i32
    return %c0_i32, %arg1 : i32, i32
  }
  func.func @transform_3(%arg0: i32, %arg1: i32) -> (i32, i32) {
    %c0_i32 = arith.constant 0 : i32
    return %arg0, %arg1 : i32, i32
  }
}

</mosaic_0001>

<bundles_post_ra>
// kernel: lstm_model_forward.9
= control target key start
LH: loop header
LB: loop body
LE: loop exit
PB: predicated region body
PF: predicated region fallthrough
CT: control target
= control target key end

     0   :  { %vm32_vm0 = vcmask 523264   ;;  %s250_s0 = inlined_call_operand.vmem [shape: f32[16,64], index: 0, kind: input, shape index: {}]   ;;  %s251_s1 = inlined_call_operand.vmem [shape: f32[64,128], index: 1, kind: input, shape index: {}]   ;;  %s252_s2 = inlined_call_operand.vmem [shape: f32[1,128], index: 2, kind: input, shape index: {}]   ;;  %s253_s3 = inlined_call_operand.hbm [shape: f32[16,128], index: 3, kind: output, shape index: {}]  }
   0x1   :  { %v24_v0 = vld [vmem:[%s251_s1 + $0x38] sm:$0xff]  ;;  %v23_v1 = vld [vmem:[%s251_s1 + $0x30] sm:$0xff]  ;;  %v22_v2 = vld [vmem:[%s251_s1 + $0x28] sm:$0xff] }
   0x2   :  { %145 = vmatprep.subr.mxu0 %v24_v0  ;;  %v15_v3 = vld [vmem:[%s250_s0] sm:$0xff] }
   0x3   :  { %146 = vmatpush3.msra.mxu0 %v24_v0  ;;  %161 = vmatprep.mubr.msk.f32.mxu0 %vm32_vm0, %v15_v3 }
   0x4   :  { %147 = vmatprep.subr.mxu0 %v23_v1 }
   0x5   :  { %8 = vsyncpa [#allocation3], 0  ;;  %148 = vmatpush3.msra.mxu0 %v23_v1  ;;  %v21_v4 = vld [vmem:[%s251_s1 + $0x20] sm:$0xff]  ;;  %v20_v5 = vld [vmem:[%s251_s1 + $0x18] sm:$0xff]  ;;  %s189_s7 = smov [#allocation2]  }
   0x6   :  { %149 = vmatprep.subr.mxu0 %v22_v2  ;;  %v19_v6 = vld [vmem:[%s251_s1 + $0x10] sm:$0xff]  ;;  %v18_v7 = vld [vmem:[%s251_s1 + $0x8] sm:$0xff]  ;;  %v17_v8 = vld [vmem:[%s251_s1] sm:$0xff]  ;;  %s121_s8 = sshll.u32 %s189_s7, 4  ;;  %s122_s8 = int_to_ptr.vmem [resolvable:$true] %s121_s8 }
   0x7   :  { %150 = vmatpush3.msra.mxu0 %v22_v2  ;;  %v16_v9 = vld [vmem:[%s250_s0 + $0x8] sm:$0xff]  ;;  %v132_v10 = vld [vmem:[%s252_s2] ss:$0 sm:$0xff]  ;;  %s167_s1 = scalar_lea.vmem %s122_s8, 256  ;;  %p172_p1 = scmp.lt.s32.totalorder %s122_s8, %s122_s8 }
   0x8   :  { %151 = vmatprep.subr.mxu0 %v21_v4  ;;  %p168_p0 = scmp.ne.s32.totalorder %s122_s8, %s167_s1  ;;  %p173_p2 = scmp.lt.s32.totalorder %s167_s1, %s167_s1 }
   0x9   :  { %152 = vmatpush3.msra.mxu0 %v21_v4 }
   0xa   :  { %153 = vmatprep.subr.mxu0 %v20_v5  ;;  %p174_p3 = por %p173_p2, %p172_p1 }
   0xb   :  { %154 = vmatpush3.msra.mxu0 %v20_v5 }
   0xc   :  { %155 = vmatprep.subr.mxu0 %v19_v6  ;;  %p175_p4 = pnand %p174_p3, %p168_p0 }
   0xd   :  { %156 = vmatpush3.msra.mxu0 %v19_v6 }
   0xe   :  { %157 = vmatprep.subr.mxu0 %v18_v7 }
   0xf   :  { %158 = vmatpush3.msra.mxu0 %v18_v7 }
  0x10   :  { %159 = vmatprep.subr.mxu0 %v17_v8 }
  0x11   :  { %160 = vmatpush3.msra.mxu0 %v17_v8 }
  0x12   :  { %162 = vmatmul.mubr.msk.f32.vlgmr.msra.gmra.mxu0 %vm32_vm0, %v16_v9 }
  0xd2   :  { %v163_v11 = vpop.f32.mrf.mxu0 }
  0xd3   :  { %v111_v12 = vadd.f32 %v163_v11, %v132_v10 }
  0xd4   :  { %v105_v13 = vpop.f32.mrf.mxu0 }
  0xd5   :  { %115 = vst [vmem:[#allocation2 + $0x8] sm:$0xff] %v111_v12  ;;  %v106_v14 = vadd.f32 %v132_v10, %v105_v13 }
  0xd7   :  { %114 = vst [vmem:[#allocation2] sm:$0xff] %v106_v14 }
  0xd8   :  { %178 = shalt.err (!%p175_p4)
}
  0xd9   :  { %s190_s0 = smov 128   ;;  %s191_s9 = smov 8  }
  0xda   :  { %127 = dma.vmem_to_hbm [thread:$0]  %s122_s8, 256, %s253_s3, [#allocation3], %s190_s0, %s190_s0, %s191_s9  }
  0xdb   :  { %187 = dma.done.wait [#allocation3], 256  }
  0xdc   :  { %188 = vsyncadd [#allocation3], 4294967040 }
  0xdd   :  { %131 = vsyncpa [#allocation3], 1 }

// kernel: lstm_model_forward.5
= control target key start
LH: loop header
LB: loop body
LE: loop exit
PB: predicated region body
PF: predicated region fallthrough
CT: control target
= control target key end

     0   :  { %s636_s12 = smov 0   ;;  %s638_s13 = smov 0   ;;  %s701_s0 = inlined_call_operand.vmem [shape: f32[1,8,2,32], index: 0, kind: input, shape index: {}]   ;;  %s702_s1 = inlined_call_operand.vmem [shape: f32[2,32,128], index: 1, kind: input, shape index: {}]   ;;  %s703_s2 = inlined_call_operand.vmem [shape: f32[2,1,128], index: 2, kind: input, shape index: {}]   ;;  %s704_s3 = inlined_call_operand.vmem [shape: f32[2,8,2,128], index: 3, kind: output, shape index: {}]  }
   0x1   :  { %s640_s14 = smov 0  }
   0x2 LB: > { %s25_s15 = sadd.s32 1, %s609_s13  ;;  %p533_p0 = scmp.ge.s32.totalorder %s613_s14, 1  ;;  %s613_s14 = sphi %s640_s14, %s13_s14   ;;  %s609_s13 = sphi %s638_s13, %s706_s13   ;;  %s605_s12 = sphi %s636_s12, %s705_s12  }
   0x3   : > { %p27_p1 = scmp.ge.s32.totalorder %s25_s15, 2  ;;  %p170_p2 = scmp.lt.s32.totalorder %s613_s14, 3 }
   0x5   : > { %s708_s15 = smov (%p27_p1, %s25_s15), 0  ;;  %p171_p3 = pnand %p533_p0, %p170_p2 }
   0x6   : > { %p212_p4 = scmp.lt.s32.totalorder (!%p171_p3), %s605_s12, 1 }
   0x7   : > { %174 = sbr.rel (%p171_p3) target bundleno = 229 (0xe5), region = 32 }
   0xc   : > { %v230_v0 = vld [vmem:[%s701_s0] sm:$0x3]  ;;  %v231_v1 = vld [vmem:[%s701_s0 + $0x2] sm:$0x3]  ;;  %v262_v2 = vlaneseq  ;;  %v232_v3 = vld [vmem:[%s701_s0 + $0x4] sm:$0x3] }
   0xd   : > { %v233_v4 = vld [vmem:[%s701_s0 + $0x6] sm:$0x3]  ;;  %s710_s12 = smov (!%p212_p4, %s605_s12), 1  ;;  %v615_v5 = vmov 1983009808   ;;  %v257_v10 = vcombine.low %v230_v0, %v231_v1  ;;  %vm291_vm0 = vcmask 261120  }
   0xe   : > { %v260_v6 = vunpack.c.l.s4 %v615_v5  ;;  %v263_v7 = vshrl.u32 %v262_v2, 7  ;;  %v234_v8 = vld [vmem:[%s701_s0 + $0x8] sm:$0x3]  ;;  %v235_v9 = vld [vmem:[%s701_s0 + $0xa] sm:$0x3]  ;;  %s547_s5 = sshll.u32 %s710_s12, 5  ;;  %v258_v13 = vcombine.low %v232_v3, %v233_v4  ;;  %s219_s11 = scalar_lea.vmem %s703_s2, %s710_s12 }
   0xf   : > { %v236_v11 = vld [vmem:[%s701_s0 + $0xc] sm:$0x3]  ;;  %v237_v12 = vld [vmem:[%s701_s0 + $0xe] sm:$0x3]  ;;  %v274_v15 = vcombine.low %v234_v8, %v235_v9  ;;  %s216_s8 = scalar_lea.vmem %s702_s1, %s547_s5  ;;  %s548_s16 = sshll.u32 %s710_s12, 4 }
  0x10   : > { %v261_v14 = vunpack.c.0.s8 %v260_v6  ;;  %v275_v16 = vcombine.low %v236_v11, %v237_v12  ;;  %v241_v17 = vld [vmem:[%s216_s8 + $0x18] sm:$0xff]  ;;  %v240_v18 = vld [vmem:[%s216_s8 + $0x10] sm:$0xff]  ;;  %v239_v20 = vld [vmem:[%s216_s8 + $0x8] sm:$0xff]  ;;  %s228_s19 = scalar_lea.vmem %s704_s3, %s548_s16 }
  0x11   : > { %555 = vmatprep.subr.mxu0 %v241_v17  ;;  %v238_v25 = vld [vmem:[%s216_s8] sm:$0xff] }
  0x12   : > { %v264_v19 = vsub.s32 %v261_v14, %v263_v7  ;;  %556 = vmatpush3.msra.mxu0 %v241_v17  ;;  %v538_v28 = vld [vmem:[%s219_s11] ss:$0 sm:$0xff] }
  0x13   : > { %557 = vmatprep.subr.mxu0 %v240_v18 }
  0x14   : > { %v265_v21 = vrot.slane %v257_v10, %v264_v19  ;;  %v272_v22 = vrot.slane %v258_v13, %v264_v19  ;;  %v282_v23 = vrot.slane %v274_v15, %v264_v19  ;;  %v289_v24 = vrot.slane %v275_v16, %v264_v19  ;;  %558 = vmatpush3.msra.mxu0 %v240_v18 }
  0x15   : > { %559 = vmatprep.subr.mxu0 %v239_v20 }
  0x16   : > { %v273_v26 = vcombine.low %v265_v21, %v272_v22  ;;  %v290_v27 = vcombine.low %v282_v23, %v289_v24  ;;  %560 = vmatpush3.msra.mxu0 %v239_v20 }
  0x17   : > { %561 = vmatprep.subr.mxu0 %v238_v25 }
  0x18   : > { %563 = vmatprep.mubr.msk.f32.mxu0 %vm291_vm0, %v273_v26  ;;  %562 = vmatpush3.msra.mxu0 %v238_v25 }
  0x19   : > { %564 = vmatmul.mubr.msk.f32.vlgmr.msra.gmra.mxu0 %vm291_vm0, %v290_v27 }
  0xd9   : > { %v565_v29 = vpop.f32.mrf.mxu0 }
  0xda   : > { %v368_v30 = vadd.f32 %v565_v29, %v538_v28 }
  0xdb   : > { %v362_v31 = vpop.f32.mrf.mxu0 }
  0xdc   : > { %v390_v32 = vcombine.high %v368_v30, %v368_v30  ;;  %v397_v33 = vrot.slane %v368_v30, %v264_v19  ;;  %543 = vst.sshfl [vmem:[%s228_s19 + $0x8] sm:$0x3 pattern:$0x76325410] %v368_v30  ;;  %v363_v34 = vadd.f32 %v538_v28, %v362_v31 }
  0xde   : > { %v404_v35 = vrot.slane %v390_v32, %v264_v19  ;;  %v405_v36 = vcombine.high %v397_v33, %v397_v33  ;;  %544 = vst.sshfl [vmem:[%s228_s19 + $0xc] sm:$0x3 pattern:$0x76325410] %v390_v32  ;;  %v373_v37 = vcombine.high %v363_v34, %v363_v34  ;;  %v380_v38 = vrot.slane %v363_v34, %v264_v19 }
  0xdf   : > { %541 = vst.sshfl [vmem:[%s228_s19] sm:$0x3 pattern:$0x76325410] %v363_v34 }
  0xe0   : > { %v406_v39 = vcombine.high %v404_v35, %v404_v35  ;;  %420 = vst [vmem:[%s228_s19 + $0xa] sm:$0x3] %v405_v36  ;;  %v387_v40 = vrot.slane %v373_v37, %v264_v19  ;;  %v388_v41 = vcombine.high %v380_v38, %v380_v38  ;;  %542 = vst.sshfl [vmem:[%s228_s19 + $0x4] sm:$0x3 pattern:$0x76325410] %v373_v37 }
  0xe2   : > { %422 = vst [vmem:[%s228_s19 + $0xe] sm:$0x3] %v406_v39  ;;  %v389_v42 = vcombine.high %v387_v40, %v387_v40  ;;  %416 = vst [vmem:[%s228_s19 + $0x2] sm:$0x3] %v388_v41 }
  0xe4   : > { %418 = vst [vmem:[%s228_s19 + $0x6] sm:$0x3] %v389_v42 }
  0xe5 PF: > { %s13_s14 = sadd.s32 1, %s613_s14   ;;  %s705_s12 = smov %s609_s13 }
  0xe6   : > { %p10_p5 = scmp.ge.s32.totalorder %s13_s14, 4   ;;  %s706_s13 = smov %s708_s15 }
  0xe8   :  { %12 = sbr.rel (!%p10_p5) target bundleno = 2 (0x2), region = 68 }

// kernel: lstm_model_forward.7
= control target key start
LH: loop header
LB: loop body
LE: loop exit
PB: predicated region body
PF: predicated region fallthrough
CT: control target
= control target key end

     0   :  { %s799_s12 = smov 0   ;;  %s801_s13 = smov 0   ;;  %s912_s0 = inlined_call_operand.vmem [shape: f32[2,8,2,32], index: 0, kind: input, shape index: {}]   ;;  %s913_s1 = inlined_call_operand.vmem [shape: f32[2,64,128], index: 1, kind: input, shape index: {}]   ;;  %s914_s2 = inlined_call_operand.vmem [shape: f32[2,1,128], index: 2, kind: input, shape index: {}]   ;;  %s915_s3 = inlined_call_operand.vmem [shape: f32[2,8,2,128], index: 3, kind: output, shape index: {}]  }
   0x1   :  { %s803_s14 = smov 0  }
   0x2 LB: > { %s25_s15 = sadd.s32 1, %s772_s13  ;;  %p669_p0 = scmp.ge.s32.totalorder %s776_s14, 1  ;;  %s776_s14 = sphi %s803_s14, %s13_s14   ;;  %s772_s13 = sphi %s801_s13, %s917_s13   ;;  %s768_s12 = sphi %s799_s12, %s916_s12  }
   0x3   : > { %p27_p1 = scmp.ge.s32.totalorder %s25_s15, 2  ;;  %p170_p2 = scmp.lt.s32.totalorder %s776_s14, 3 }
   0x5   : > { %s919_s15 = smov (%p27_p1, %s25_s15), 0  ;;  %p171_p3 = pnand %p669_p0, %p170_p2 }
   0x6   : > { %p212_p4 = scmp.lt.s32.totalorder (!%p171_p3), %s768_s12, 1 }
   0x7   : > { %174 = sbr.rel (%p171_p3) target bundleno = 234 (0xea), region = 32 }
   0xc   : > { %v674_v0 = vld [vmem:[%s912_s0 + $0x10] sm:$0x3]  ;;  %v675_v1 = vld [vmem:[%s912_s0 + $0x12] sm:$0x3]  ;;  %v268_v2 = vlaneseq  ;;  %v676_v3 = vld [vmem:[%s912_s0 + $0x14] sm:$0x3] }
   0xd   : > { %v677_v4 = vld [vmem:[%s912_s0 + $0x16] sm:$0x3]  ;;  %s921_s12 = smov (!%p212_p4, %s768_s12), 1  ;;  %v778_v5 = vmov 1983009808   ;;  %v263_v13 = vcombine.low %v674_v0, %v675_v1  ;;  %vm297_vm0 = vcmask 261120  }
   0xe   : > { %v266_v6 = vunpack.c.l.s4 %v778_v5  ;;  %v269_v7 = vshrl.u32 %v268_v2, 7  ;;  %v230_v8 = vld [vmem:[%s912_s0] sm:$0x3]  ;;  %v231_v9 = vld [vmem:[%s912_s0 + $0x2] sm:$0x3]  ;;  %s693_s7 = sshll.u32 %s921_s12, 6  ;;  %v264_v14 = vcombine.low %v676_v3, %v677_v4  ;;  %s219_s4 = scalar_lea.vmem %s914_s2, %s921_s12 }
   0xf   : > { %v232_v10 = vld [vmem:[%s912_s0 + $0x4] sm:$0x3]  ;;  %v233_v11 = vld [vmem:[%s912_s0 + $0x6] sm:$0x3]  ;;  %v678_v12 = vld [vmem:[%s912_s0 + $0x18] sm:$0x3]  ;;  %v385_v16 = vcombine.low %v230_v8, %v231_v9  ;;  %s856_s18 = scalar_lea.vmem %s913_s1, %s693_s7 }
  0x10   : > { %v267_v15 = vunpack.c.0.s8 %v266_v6  ;;  %v679_v17 = vld [vmem:[%s912_s0 + $0x1a] sm:$0x3]  ;;  %v680_v18 = vld [vmem:[%s912_s0 + $0x1c] sm:$0x3]  ;;  %v386_v19 = vcombine.low %v232_v10, %v233_v11  ;;  %v681_v20 = vld [vmem:[%s912_s0 + $0x1e] sm:$0x3] }
  0x11   : > { %v280_v21 = vcombine.low %v678_v12, %v679_v17  ;;  %v234_v22 = vld [vmem:[%s912_s0 + $0x8] sm:$0x3]  ;;  %v235_v23 = vld [vmem:[%s912_s0 + $0xa] sm:$0x3]  ;;  %v254_v24 = vld [vmem:[%s856_s18 + $0x38] sm:$0xff]  ;;  %v281_v28 = vcombine.low %v680_v18, %v681_v20  ;;  %s694_s5 = sshll.u32 %s921_s12, 4 }
  0x12   : > { %v241_v25 = vld [vmem:[%s856_s18 + $0x18] sm:$0xff]  ;;  %v253_v26 = vld [vmem:[%s856_s18 + $0x30] sm:$0xff]  ;;  %v870_v27 = vsub.s32 %v267_v15, %v269_v7  ;;  %v402_v29 = vcombine.low %v234_v22, %v235_v23  ;;  %707 = vmatprep.subr.mxu0 %v254_v24  ;;  %v252_v31 = vld [vmem:[%s856_s18 + $0x28] sm:$0xff]  ;;  %s228_s8 = scalar_lea.vmem %s915_s3, %s694_s5 }
  0x13   : > { %718 = vmatprep.subr.mxu1 %v241_v25  ;;  %v240_v30 = vld [vmem:[%s856_s18 + $0x10] sm:$0xff]  ;;  %708 = vmatpush3.msra.mxu0 %v254_v24  ;;  %v239_v32 = vld [vmem:[%s856_s18 + $0x8] sm:$0xff]  ;;  %v251_v41 = vld [vmem:[%s856_s18 + $0x20] sm:$0xff] }
  0x14   : > { %719 = vmatpush3.msra.mxu1 %v241_v25  ;;  %v271_v33 = vrot.slane %v263_v13, %v870_v27  ;;  %v278_v34 = vrot.slane %v264_v14, %v870_v27  ;;  %v393_v35 = vrot.slane %v385_v16, %v870_v27  ;;  %v236_v36 = vld [vmem:[%s912_s0 + $0xc] sm:$0x3]  ;;  %709 = vmatprep.subr.mxu0 %v253_v26  ;;  %v237_v40 = vld [vmem:[%s912_s0 + $0xe] sm:$0x3]  ;;  %v238_v42 = vld [vmem:[%s856_s18] sm:$0xff] }
  0x15   : > { %720 = vmatprep.subr.mxu1 %v240_v30  ;;  %v400_v37 = vrot.slane %v386_v19, %v870_v27  ;;  %v288_v38 = vrot.slane %v280_v21, %v870_v27  ;;  %v295_v39 = vrot.slane %v281_v28, %v870_v27  ;;  %710 = vmatpush3.msra.mxu0 %v253_v26  ;;  %v686_v52 = vld [vmem:[%s219_s4] ss:$0 sm:$0xff] }
  0x16   : > { %721 = vmatpush3.msra.mxu1 %v240_v30  ;;  %v279_v43 = vcombine.low %v271_v33, %v278_v34  ;;  %v403_v44 = vcombine.low %v236_v36, %v237_v40  ;;  %v410_v45 = vrot.slane %v402_v29, %v870_v27  ;;  %711 = vmatprep.subr.mxu0 %v252_v31 }
  0x17   : > { %722 = vmatprep.subr.mxu1 %v239_v32  ;;  %v401_v46 = vcombine.low %v393_v35, %v400_v37  ;;  %712 = vmatpush3.msra.mxu0 %v252_v31  ;;  %v296_v47 = vcombine.low %v288_v38, %v295_v39 }
  0x18   : > { %723 = vmatpush3.msra.mxu1 %v239_v32  ;;  %v417_v48 = vrot.slane %v403_v44, %v870_v27  ;;  %713 = vmatprep.subr.mxu0 %v251_v41 }
  0x19   : > { %724 = vmatprep.subr.mxu1 %v238_v42  ;;  %714 = vmatpush3.msra.mxu0 %v251_v41 }
  0x1a   : > { %715 = vmatprep.mubr.msk.f32.mxu0 %vm297_vm0, %v279_v43  ;;  %v418_v49 = vcombine.low %v410_v45, %v417_v48  ;;  %725 = vmatpush3.msra.mxu1 %v238_v42 }
  0x1b   : > { %726 = vmatprep.mubr.msk.f32.mxu1 %vm297_vm0, %v401_v46  ;;  %716 = vmatmul.mubr.msk.f32.vlgmr.msra.gmra.mxu0 %vm297_vm0, %v296_v47 }
  0x1c   : > { %727 = vmatmul.mubr.msk.f32.vlgmr.msra.gmra.mxu1 %vm297_vm0, %v418_v49 }
  0xdb   : > { %v717_v50 = vpop.f32.mrf.mxu0 }
  0xdc   : > { %v728_v51 = vpop.f32.mrf.mxu1 }
  0xdd   : > { %v495_v53 = vadd.f32 %v728_v51, %v717_v50  ;;  %v368_v54 = vpop.f32.mrf.mxu0 }
  0xde   : > { %v489_v55 = vpop.f32.mrf.mxu1 }
  0xdf   : > { %v506_v56 = vadd.f32 %v686_v52, %v495_v53  ;;  %v490_v57 = vadd.f32 %v489_v55, %v368_v54 }
  0xe1   : > { %v526_v58 = vcombine.high %v506_v56, %v506_v56  ;;  %v533_v59 = vrot.slane %v506_v56, %v870_v27  ;;  %689 = vst.sshfl [vmem:[%s228_s8 + $0x8] sm:$0x3 pattern:$0x76325410] %v506_v56  ;;  %v505_v60 = vadd.f32 %v686_v52, %v490_v57 }
  0xe3   : > { %v540_v61 = vrot.slane %v526_v58, %v870_v27  ;;  %v541_v62 = vcombine.high %v533_v59, %v533_v59  ;;  %690 = vst.sshfl [vmem:[%s228_s8 + $0xc] sm:$0x3 pattern:$0x76325410] %v526_v58  ;;  %v509_v63 = vcombine.high %v505_v60, %v505_v60  ;;  %v516_v0 = vrot.slane %v505_v60, %v870_v27 }
  0xe4   : > { %687 = vst.sshfl [vmem:[%s228_s8] sm:$0x3 pattern:$0x76325410] %v505_v60 }
  0xe5   : > { %v542_v1 = vcombine.high %v540_v61, %v540_v61  ;;  %556 = vst [vmem:[%s228_s8 + $0xa] sm:$0x3] %v541_v62  ;;  %v523_v2 = vrot.slane %v509_v63, %v870_v27  ;;  %v524_v3 = vcombine.high %v516_v0, %v516_v0  ;;  %688 = vst.sshfl [vmem:[%s228_s8 + $0x4] sm:$0x3 pattern:$0x76325410] %v509_v63 }
  0xe7   : > { %558 = vst [vmem:[%s228_s8 + $0xe] sm:$0x3] %v542_v1  ;;  %v525_v4 = vcombine.high %v523_v2, %v523_v2  ;;  %552 = vst [vmem:[%s228_s8 + $0x2] sm:$0x3] %v524_v3 }
  0xe9   : > { %554 = vst [vmem:[%s228_s8 + $0x6] sm:$0x3] %v525_v4 }
  0xea PF: > { %s13_s14 = sadd.s32 1, %s776_s14   ;;  %s916_s12 = smov %s772_s13 }
  0xeb   : > { %p10_p5 = scmp.ge.s32.totalorder %s13_s14, 4   ;;  %s917_s13 = smov %s919_s15 }
  0xed   :  { %12 = sbr.rel (!%p10_p5) target bundleno = 2 (0x2), region = 69 }

// kernel: lstm_model_forward.6
= control target key start
LH: loop header
LB: loop body
LE: loop exit
PB: predicated region body
PF: predicated region fallthrough
CT: control target
= control target key end

     0   :  { %s1996_s21 = smov 0   ;;  %s1998_s22 = smov 0   ;;  %s2295_s0 = inlined_call_operand.vmem [shape: f32[2,8,2,128], index: 0, kind: input, shape index: {}]   ;;  %s2296_s1 = inlined_call_operand.vmem [shape: f32[2,32,128], index: 1, kind: input, shape index: {}]   ;;  %s2297_s2 = inlined_call_operand.vmem [shape: f32[2,2,32], index: 2, kind: input, shape index: {}]   ;;  %s2298_s3 = inlined_call_operand.vmem [shape: f32[2,2,32], index: 3, kind: input, shape index: {}]   ;;  %s2299_s4 = inlined_call_operand.vmem [shape: f32[2,8,2,32], index: 4, kind: output, shape index: {0}]   ;;  %s2300_s5 = inlined_call_operand.vmem [shape: f32[2,2,32], index: 5, kind: output, shape index: {1}]   ;;  %s2301_s6 = inlined_call_operand.vmem [shape: f32[2,2,32], index: 6, kind: output, shape index: {2}]  }
   0x1   :  { %s2000_s23 = smov 0  }
   0x2 LB: > { %s29_s24 = sadd.s32 1, %s1950_s22  ;;  %p1653_p0 = scmp.ge.s32.totalorder %s1954_s23, 1  ;;  %s1954_s23 = sphi %s2000_s23, %s17_s23   ;;  %s1950_s22 = sphi %s1998_s22, %s2303_s22   ;;  %s1946_s21 = sphi %s1996_s21, %s2302_s21  }
   0x3   : > { %p31_p1 = scmp.ge.s32.totalorder %s29_s24, 2  ;;  %p290_p2 = scmp.lt.s32.totalorder %s1954_s23, 3 }
   0x5   : > { %s2305_s24 = smov (%p31_p1, %s29_s24), 0  ;;  %p291_p3 = pnand %p1653_p0, %p290_p2 }
   0x6   : > { %p362_p4 = scmp.lt.s32.totalorder (!%p291_p3), %s1946_s21, 1  ;;  %s1664_s14 = smul.u32 (!%p291_p3), 14, %s1946_s21 }
   0x7   : > { %294 = sbr.rel (%p291_p3) target bundleno = 5602 (0x15e2), region = 36  ;;  %s1958_s19 = smov (!%p291_p3), 64  }
   0x8   : > { %s1959_s20 = smov (!%p291_p3), 32   ;;  %s1673_s10 = smul.u32 (!%p291_p3), 6, %s1946_s21 }
   0x9   : > { %s911_s16 = ssub.s32 (!%p291_p3), 4, %s1946_s21 }
   0xc   : > { %v1956_v0 = vmov 0.0   ;;  %vm1957_vm0 = vmmov 0   ;;  %s2021_s25 = scalar_select %p362_p4, %s1946_s21, 1  ;;  %vm419_vm1 = vcmask 254976   ;;  %vm433_vm2 = vcmask 261120  }
   0xd   : > { %1751 = vmatprep.subr.mxu0 %v1956_v0  ;;  %1759 = vmatprep.mubr.msk.f32.mxu0 %vm1957_vm0, %v1956_v0 }
   0xe   : > { %1762 = vmatprep.subr.mxu1 %v1956_v0  ;;  %1770 = vmatprep.mubr.msk.f32.mxu1 %vm1957_vm0, %v1956_v0  ;;  %s1709_s26 = sshll.u32 %s2021_s25, 5  ;;  %s2028_s27 = sshll.u32 %s2021_s25, 1 }
   0xf   : > { %s379_s30 = scalar_lea.vmem %s2296_s1, %s1709_s26  ;;  %s383_s9 = scalar_lea.vmem %s2297_s2, %s2028_s27 }
  0x10   : > { %s387_s12 = scalar_lea.vmem %s2298_s3, %s2028_s27  ;;  %v418_v1 = vld [vmem:[%s383_s9] sm:$0x3]  ;;  %v2041_v2 = vld [vmem:[%s379_s30 + $0x18] sm:$0xff]  ;;  %v2043_v3 = vld [vmem:[%s379_s30 + $0x10] sm:$0xff]  ;;  %s1708_s13 = sshll.u32 %s2021_s25, 4 }
  0x11   : > { %420 = vst.msk [vmem:[#allocation2] sm:$0x3] %vm419_vm1, %v418_v1  ;;  %v421_v4 = vld [vmem:[%s387_s12] sm:$0x3]  ;;  %1752 = vmatpush3.msra.mxu0 %v2041_v2  ;;  %1763 = vmatpush3.msra.mxu1 %v2041_v2  ;;  %v2050_v5 = vld [vmem:[%s379_s30 + $0x8] sm:$0xff]  ;;  %s2085_s17 = scalar_lea.vmem %s2295_s0, %s1708_s13  ;;  %s1960_s26 = smov 96  }
  0x12   : > { %422 = vst.msk [vmem:[#allocation3] sm:$0x3] %vm419_vm1, %v421_v4  ;;  %1753 = vmatprep.subr.mxu0 %v1956_v0  ;;  %1764 = vmatprep.subr.mxu1 %v1956_v0  ;;  %v2056_v6 = vld [vmem:[%s379_s30] sm:$0xff]  ;;  %s429_s18 = scalar_lea.vmem %s2085_s17, %s1664_s14  ;;  %s2103_s30 = scalar_lea.vmem %s2299_s4, %s1708_s13 }
  0x13   : > { %1754 = vmatpush3.msra.mxu0 %v2043_v3  ;;  %1765 = vmatpush3.msra.mxu1 %v2043_v3  ;;  %v430_v8 = vld [vmem:[%s429_s18] sm:$0x3]  ;;  %s547_s7 = scalar_lea.vmem %s2103_s30, %s1664_s14  ;;  %s1667_s25 = smul.u32 10, %s1946_s21 }
  0x14   : > { %1755 = vmatprep.subr.mxu0 %v1956_v0  ;;  %1766 = vmatprep.subr.mxu1 %v1956_v0  ;;  %s1528_s11 = scalar_lea.vmem %s2085_s17, %s1673_s10  ;;  %s1532_s12 = scalar_lea.vmem %s2103_s30, %s1673_s10 }
  0x15   : > { %1756 = vmatpush3.msra.mxu0 %v2050_v5  ;;  %1767 = vmatpush3.msra.mxu1 %v2050_v5  ;;  %s1520_s8 = scalar_lea.vmem %s2085_s17, %s1667_s25  ;;  %s1524_s9 = scalar_lea.vmem %s2103_s30, %s1667_s25  ;;  %v1674_v53 = vld [vmem:[%s1528_s11 + $0x4] sm:$0x3] }
  0x16   : > { %1757 = vmatprep.subr.mxu0 %v1956_v0  ;;  %1768 = vmatprep.subr.mxu1 %v1956_v0  ;;  %v1668_v31 = vld [vmem:[%s1520_s8 + $0x2] sm:$0x3]  ;;  %s1679_s13 = sshll.u32 %s1946_s21, 1  ;;  %s2202_s18 = sshll.u32 %s911_s16, 1 }
  0x17   : > { %1758 = vmatpush3.msra.mxu0 %v2056_v6  ;;  %1769 = vmatpush3.msra.mxu1 %v2056_v6  ;;  %s1535_s14 = scalar_lea.vmem %s2085_s17, %s1679_s13  ;;  %s1538_s15 = scalar_lea.vmem %s2103_s30, %s1679_s13 }
  0x18   : > { %v431_v7 = vld [vmem:[#allocation2] sm:$0x3]  ;;  %1773 = vmatprep.subr.mxu0 %v1956_v0  ;;  %1784 = vmatprep.subr.mxu1 %v1956_v0  ;;  %s913_s28 = scalar_lea.vmem %s2085_s17, %s2202_s18  ;;  %s1029_s29 = scalar_lea.vmem %s2103_s30, %s2202_s18 }
  0x19   : > { %1760 = vmatmul.mubr.msk.f32.vlgmr.msra.gmra.mxu0 %vm433_vm2, %v431_v7  ;;  %v432_v13 = vld [vmem:[#allocation3] sm:$0x3] }
  0x1a   : > { %1774 = vmatpush3.msra.mxu0 %v2041_v2  ;;  %1781 = vmatprep.mubr.msk.f32.mxu0 %vm1957_vm0, %v1956_v0 }
  0x1b   : > { %1775 = vmatprep.subr.mxu0 %v1956_v0 }
  0x1c   : > { %1776 = vmatpush3.msra.mxu0 %v2043_v3 }
  0x1d   : > { %1777 = vmatprep.subr.mxu0 %v1956_v0 }
  0x1e   : > { %1778 = vmatpush3.msra.mxu0 %v2050_v5 }
  0x1f   : > { %1779 = vmatprep.subr.mxu0 %v1956_v0 }
  0x20   : > { %1780 = vmatpush3.msra.mxu0 %v2056_v6 }
  0x21   : > { %1795 = vmatprep.subr.mxu0 %v1956_v0 }
  0xd9   : > { %v503_v9 = vpop.f32.mrf.mxu0 }
  0xda   : > { %v507_v10 = vadd.f32 %v503_v9, %v430_v8 }
  0xdb   : > { %v1761_v11 = vpop.f32.mrf.mxu0 }
  0xdc   : > { %1868 = vtanh.f32 %v507_v10  ;;  %v1666_v14 = vmul.f32 -1.442695, %v507_v10 }
  0xde   : > { %1870 = vpow2.f32 %v1666_v14 }
  0xe9   : > { %v1869_v12 = vpop.eup %1868 }
  0xea   : > { %521 = vrot.lane.b32.xlu0 %v1869_v12, %s1958_s19 }
  0xeb   : > { %v1871_v15 = vpop.eup %1870 }
  0xec   : > { %v511_v16 = vadd.f32 1.0, %v1871_v15 }
  0xee   : > { %516 = vrot.lane.b32.xlu0 %v432_v13, %s1959_s20  ;;  %1872 = vrcp.f32 %v511_v16  ;;  %v1680_v16 = vld [vmem:[%s1535_s14 + $0x6] sm:$0x3] }
  0xfb   : > { %v1873_v17 = vpop.eup %1872 }
 0x15c   : > { %v522_v18 = vpop.permute.xlu0 %521 }
 0x15d   : > { %v524_v19 = vmul.f32 %v1873_v17, %v522_v18 }
 0x15f   : > { %526 = vrot.lane.b32.xlu1 %v524_v19, %s1959_s20 }
 0x160   : > { %v517_v20 = vpop.permute.xlu0 %516 }
 0x161   : > { %v519_v21 = vmul.f32 %v1873_v17, %v517_v20 }
 0x1d1   : > { %v527_v22 = vpop.permute.xlu1 %526 }
 0x1d2   : > { %v529_v23 = vadd.f32 %v527_v22, %v519_v21 }
 0x1d4   : > { %1874 = vtanh.f32 %v529_v23 }
 0x1e1   : > { %v1875_v24 = vpop.eup %1874 }
 0x1e2   : > { %532 = vrot.lane.b32.xlu1 %v1875_v24, %s1958_s19 }
 0x1e6   : > { %543 = vrot.lane.b32.xlu1 %v529_v23, %s1960_s26 }
 0x254   : > { %v533_v25 = vpop.permute.xlu1 %532 }
 0x255   : > { %v535_v26 = vmul.f32 %v1873_v17, %v533_v25 }
 0x257   : > { %537 = vrot.lane.b32.xlu0 %v535_v26, %s1959_s20 }
 0x258   : > { %v544_v27 = vpop.permute.xlu1 %543 }
 0x259   : > { %546 = vst.msk [vmem:[#allocation3] sm:$0x3] %vm419_vm1, %v544_v27 }
 0x260   : > { %v555_v28 = vld [vmem:[#allocation3] sm:$0x3] }
 0x261   : > { %638 = vrot.lane.b32.xlu1 %v555_v28, %s1959_s20 }
 0x2c9   : > { %v538_v29 = vpop.permute.xlu0 %537 }
 0x2ca   : > { %541 = vst.msk [vmem:[#allocation2] sm:$0x3] %vm419_vm1, %v538_v29  ;;  %548 = vst.msk [vmem:[%s547_s7] sm:$0x3] %vm419_vm1, %v538_v29  ;;  %s1688_s7 = smul.u32 4294967290, %s1946_s21 }
 0x2cc   : > { %s1546_s25 = scalar_lea.vmem %s2085_s17, %s1688_s7  ;;  %s1550_s8 = scalar_lea.vmem %s2103_s30, %s1688_s7 }
 0x2d1   : > { %v554_v30 = vld [vmem:[#allocation2] sm:$0x3] }
 0x2d2   : > { %1771 = vmatmul.mubr.msk.f32.vlgmr.msra.gmra.mxu1 %vm433_vm2, %v554_v30 }
 0x2d3   : > { %1785 = vmatpush3.msra.mxu1 %v2041_v2  ;;  %1792 = vmatprep.mubr.msk.f32.mxu1 %vm1957_vm0, %v1956_v0  ;;  %v639_v42 = vpop.permute.xlu1 %638 }
 0x2d4   : > { %1786 = vmatprep.subr.mxu1 %v1956_v0 }
 0x2d5   : > { %1787 = vmatpush3.msra.mxu1 %v2043_v3 }
 0x2d6   : > { %1788 = vmatprep.subr.mxu1 %v1956_v0 }
 0x2d7   : > { %1789 = vmatpush3.msra.mxu1 %v2050_v5 }
 0x2d8   : > { %1790 = vmatprep.subr.mxu1 %v1956_v0 }
 0x2d9   : > { %1791 = vmatpush3.msra.mxu1 %v2056_v6 }
 0x2da   : > { %1806 = vmatprep.subr.mxu1 %v1956_v0 }
 0x392   : > { %v625_v32 = vpop.f32.mrf.mxu1 }
 0x393   : > { %v629_v33 = vadd.f32 %v1668_v31, %v625_v32 }
 0x394   : > { %v1772_v34 = vpop.f32.mrf.mxu1 }
 0x395   : > { %1876 = vtanh.f32 %v629_v33  ;;  %v1670_v36 = vmul.f32 -1.442695, %v629_v33 }
 0x397   : > { %1878 = vpow2.f32 %v1670_v36 }
 0x3a2   : > { %v1877_v35 = vpop.eup %1876 }
 0x3a3   : > { %643 = vrot.lane.b32.xlu0 %v1877_v35, %s1958_s19 }
 0x3a4   : > { %v1879_v37 = vpop.eup %1878 }
 0x3a5   : > { %v633_v38 = vadd.f32 1.0, %v1879_v37 }
 0x3a7   : > { %1880 = vrcp.f32 %v633_v38  ;;  %v914_v38 = vld [vmem:[%s913_s28] sm:$0x3] }
 0x3b4   : > { %v1881_v39 = vpop.eup %1880 }
 0x3b5   : > { %v641_v43 = vmul.f32 %v1881_v39, %v639_v42 }
 0x415   : > { %v644_v40 = vpop.permute.xlu0 %643 }
 0x416   : > { %v646_v41 = vmul.f32 %v1881_v39, %v644_v40 }
 0x418   : > { %648 = vrot.lane.b32.xlu0 %v646_v41, %s1959_s20 }
 0x48a   : > { %v649_v44 = vpop.permute.xlu0 %648 }
 0x48b   : > { %v651_v45 = vadd.f32 %v649_v44, %v641_v43 }
 0x48d   : > { %1882 = vtanh.f32 %v651_v45 }
 0x49a   : > { %v1883_v46 = vpop.eup %1882 }
 0x49b   : > { %654 = vrot.lane.b32.xlu1 %v1883_v46, %s1958_s19 }
 0x49f   : > { %664 = vrot.lane.b32.xlu1 %v651_v45, %s1960_s26 }
 0x50d   : > { %v655_v47 = vpop.permute.xlu1 %654 }
 0x50e   : > { %v657_v48 = vmul.f32 %v1881_v39, %v655_v47 }
 0x510   : > { %659 = vrot.lane.b32.xlu0 %v657_v48, %s1959_s20 }
 0x511   : > { %v665_v49 = vpop.permute.xlu1 %664 }
 0x512   : > { %667 = vst.msk [vmem:[#allocation3] sm:$0x3] %vm419_vm1, %v665_v49 }
 0x519   : > { %v676_v50 = vld [vmem:[#allocation3] sm:$0x3] }
 0x51a   : > { %759 = vrot.lane.b32.xlu1 %v676_v50, %s1959_s20 }
 0x582   : > { %v660_v51 = vpop.permute.xlu0 %659 }
 0x583   : > { %662 = vst.msk [vmem:[#allocation2] sm:$0x3] %vm419_vm1, %v660_v51  ;;  %1672 = vst.msk [vmem:[%s1524_s9 + $0x2] sm:$0x3] %vm419_vm1, %v660_v51  ;;  %s1694_s9 = smul.u32 4294967286, %s1946_s21 }
 0x585   : > { %s1554_s10 = scalar_lea.vmem %s2085_s17, %s1694_s9  ;;  %s1558_s11 = scalar_lea.vmem %s2103_s30, %s1694_s9 }
 0x58a   : > { %v675_v52 = vld [vmem:[#allocation2] sm:$0x3] }
 0x58b   : > { %1782 = vmatmul.mubr.msk.f32.vlgmr.msra.gmra.mxu0 %vm433_vm2, %v675_v52 }
 0x58c   : > { %1796 = vmatpush3.msra.mxu0 %v2041_v2  ;;  %1803 = vmatprep.mubr.msk.f32.mxu0 %vm1957_vm0, %v1956_v0  ;;  %v760_v1 = vpop.permute.xlu1 %759 }
 0x58d   : > { %1797 = vmatprep.subr.mxu0 %v1956_v0 }
 0x58e   : > { %1798 = vmatpush3.msra.mxu0 %v2043_v3 }
 0x58f   : > { %1799 = vmatprep.subr.mxu0 %v1956_v0 }
 0x590   : > { %1800 = vmatpush3.msra.mxu0 %v2050_v5 }
 0x591   : > { %1801 = vmatprep.subr.mxu0 %v1956_v0 }
 0x592   : > { %1802 = vmatpush3.msra.mxu0 %v2056_v6 }
 0x593   : > { %1817 = vmatprep.subr.mxu0 %v1956_v0 }
 0x64b   : > { %v746_v54 = vpop.f32.mrf.mxu0 }
 0x64c   : > { %v750_v55 = vadd.f32 %v1674_v53, %v746_v54 }
 0x64d   : > { %v1783_v56 = vpop.f32.mrf.mxu0 }
 0x64e   : > { %1884 = vtanh.f32 %v750_v55  ;;  %v1676_v58 = vmul.f32 -1.442695, %v750_v55 }
 0x650   : > { %1886 = vpow2.f32 %v1676_v58 }
 0x65b   : > { %v1885_v57 = vpop.eup %1884 }
 0x65c   : > { %764 = vrot.lane.b32.xlu0 %v1885_v57, %s1958_s19 }
 0x65d   : > { %v1887_v59 = vpop.eup %1886 }
 0x65e   : > { %v754_v60 = vadd.f32 1.0, %v1887_v59 }
 0x660   : > { %1888 = vrcp.f32 %v754_v60  ;;  %v1689_v60 = vld [vmem:[%s1546_s25 + $0xa] sm:$0x3] }
 0x66d   : > { %v1889_v61 = vpop.eup %1888 }
 0x66e   : > { %v762_v4 = vmul.f32 %v1889_v61, %v760_v1 }
 0x6ce   : > { %v765_v62 = vpop.permute.xlu0 %764 }
 0x6cf   : > { %v767_v63 = vmul.f32 %v1889_v61, %v765_v62 }
 0x6d1   : > { %769 = vrot.lane.b32.xlu0 %v767_v63, %s1959_s20 }
 0x743   : > { %v770_v7 = vpop.permute.xlu0 %769 }
 0x744   : > { %v772_v8 = vadd.f32 %v770_v7, %v762_v4 }
 0x746   : > { %1890 = vtanh.f32 %v772_v8 }
 0x753   : > { %v1891_v9 = vpop.eup %1890 }
 0x754   : > { %775 = vrot.lane.b32.xlu1 %v1891_v9, %s1958_s19 }
 0x758   : > { %785 = vrot.lane.b32.xlu1 %v772_v8, %s1960_s26 }
 0x7c6   : > { %v776_v10 = vpop.permute.xlu1 %775 }
 0x7c7   : > { %v778_v11 = vmul.f32 %v1889_v61, %v776_v10 }
 0x7c9   : > { %780 = vrot.lane.b32.xlu0 %v778_v11, %s1959_s20 }
 0x7ca   : > { %v786_v12 = vpop.permute.xlu1 %785 }
 0x7cb   : > { %788 = vst.msk [vmem:[#allocation3] sm:$0x3] %vm419_vm1, %v786_v12 }
 0x7d2   : > { %v796_v13 = vld [vmem:[#allocation3] sm:$0x3] }
 0x7d3   : > { %879 = vrot.lane.b32.xlu1 %v796_v13, %s1959_s20 }
 0x83b   : > { %v781_v14 = vpop.permute.xlu0 %780 }
 0x83c   : > { %783 = vst.msk [vmem:[#allocation2] sm:$0x3] %vm419_vm1, %v781_v14  ;;  %1678 = vst.msk [vmem:[%s1532_s12 + $0x4] sm:$0x3] %vm419_vm1, %v781_v14  ;;  %s1700_s12 = smul.u32 4294967282, %s1946_s21 }
 0x83e   : > { %s1562_s13 = scalar_lea.vmem %s2085_s17, %s1700_s12  ;;  %s1566_s16 = scalar_lea.vmem %s2103_s30, %s1700_s12 }
 0x843   : > { %v795_v15 = vld [vmem:[#allocation2] sm:$0x3] }
 0x844   : > { %1793 = vmatmul.mubr.msk.f32.vlgmr.msra.gmra.mxu1 %vm433_vm2, %v795_v15 }
 0x845   : > { %1807 = vmatpush3.msra.mxu1 %v2041_v2  ;;  %1814 = vmatprep.mubr.msk.f32.mxu1 %vm1957_vm0, %v1956_v0  ;;  %v880_v27 = vpop.permute.xlu1 %879 }
 0x846   : > { %1808 = vmatprep.subr.mxu1 %v1956_v0 }
 0x847   : > { %1809 = vmatpush3.msra.mxu1 %v2043_v3 }
 0x848   : > { %1810 = vmatprep.subr.mxu1 %v1956_v0 }
 0x849   : > { %1811 = vmatpush3.msra.mxu1 %v2050_v5 }
 0x84a   : > { %1812 = vmatprep.subr.mxu1 %v1956_v0 }
 0x84b   : > { %1813 = vmatpush3.msra.mxu1 %v2056_v6 }
 0x84c   : > { %1828 = vmatprep.subr.mxu1 %v1956_v0 }
 0x904   : > { %v866_v17 = vpop.f32.mrf.mxu1 }
 0x905   : > { %v870_v18 = vadd.f32 %v1680_v16, %v866_v17 }
 0x906   : > { %v1794_v19 = vpop.f32.mrf.mxu1 }
 0x907   : > { %1892 = vtanh.f32 %v870_v18  ;;  %v1682_v21 = vmul.f32 -1.442695, %v870_v18  ;;  %v1695_v18 = vld [vmem:[%s1554_s10 + $0xc] sm:$0x3] }
 0x909   : > { %1894 = vpow2.f32 %v1682_v21 }
 0x914   : > { %v1893_v20 = vpop.eup %1892 }
 0x915   : > { %884 = vrot.lane.b32.xlu0 %v1893_v20, %s1958_s19 }
 0x916   : > { %v1895_v22 = vpop.eup %1894 }
 0x917   : > { %v874_v23 = vadd.f32 1.0, %v1895_v22 }
 0x919   : > { %1896 = vrcp.f32 %v874_v23 }
 0x926   : > { %v1897_v24 = vpop.eup %1896 }
 0x927   : > { %v882_v28 = vmul.f32 %v1897_v24, %v880_v27 }
 0x987   : > { %v885_v25 = vpop.permute.xlu0 %884 }
 0x988   : > { %v887_v26 = vmul.f32 %v1897_v24, %v885_v25 }
 0x98a   : > { %889 = vrot.lane.b32.xlu0 %v887_v26, %s1959_s20 }
 0x9fc   : > { %v890_v29 = vpop.permute.xlu0 %889 }
 0x9fd   : > { %v892_v30 = vadd.f32 %v890_v29, %v882_v28 }
 0x9ff   : > { %1898 = vtanh.f32 %v892_v30 }
 0xa0c   : > { %v1899_v31 = vpop.eup %1898 }
 0xa0d   : > { %895 = vrot.lane.b32.xlu1 %v1899_v31, %s1958_s19 }
 0xa11   : > { %905 = vrot.lane.b32.xlu1 %v892_v30, %s1960_s26 }
 0xa7f   : > { %v896_v32 = vpop.permute.xlu1 %895 }
 0xa80   : > { %v898_v33 = vmul.f32 %v1897_v24, %v896_v32 }
 0xa82   : > { %900 = vrot.lane.b32.xlu0 %v898_v33, %s1959_s20 }
 0xa83   : > { %v906_v34 = vpop.permute.xlu1 %905 }
 0xa84   : > { %908 = vst.msk [vmem:[#allocation3] sm:$0x3] %vm419_vm1, %v906_v34 }
 0xa8b   : > { %v916_v35 = vld [vmem:[#allocation3] sm:$0x3] }
 0xa8c   : > { %999 = vrot.lane.b32.xlu1 %v916_v35, %s1959_s20 }
 0xaf4   : > { %v901_v36 = vpop.permute.xlu0 %900 }
 0xaf5   : > { %903 = vst.msk [vmem:[#allocation2] sm:$0x3] %vm419_vm1, %v901_v36  ;;  %1684 = vst.msk [vmem:[%s1538_s15 + $0x6] sm:$0x3] %vm419_vm1, %v901_v36  ;;  %s413_s15 = scalar_lea.vmem %s2301_s6, %s2028_s27 }
 0xafc   : > { %v915_v37 = vld [vmem:[#allocation2] sm:$0x3] }
 0xafd   : > { %1804 = vmatmul.mubr.msk.f32.vlgmr.msra.gmra.mxu0 %vm433_vm2, %v915_v37 }
 0xafe   : > { %1818 = vmatpush3.msra.mxu0 %v2041_v2  ;;  %1825 = vmatprep.mubr.msk.f32.mxu0 %vm1957_vm0, %v1956_v0  ;;  %v1000_v49 = vpop.permute.xlu1 %999 }
 0xaff   : > { %1819 = vmatprep.subr.mxu0 %v1956_v0 }
 0xb00   : > { %1820 = vmatpush3.msra.mxu0 %v2043_v3 }
 0xb01   : > { %1821 = vmatprep.subr.mxu0 %v1956_v0 }
 0xb02   : > { %1822 = vmatpush3.msra.mxu0 %v2050_v5 }
 0xb03   : > { %1823 = vmatprep.subr.mxu0 %v1956_v0 }
 0xb04   : > { %1824 = vmatpush3.msra.mxu0 %v2056_v6 }
 0xbbd   : > { %v986_v39 = vpop.f32.mrf.mxu0 }
 0xbbe   : > { %v990_v40 = vadd.f32 %v986_v39, %v914_v38 }
 0xbbf   : > { %v1805_v41 = vpop.f32.mrf.mxu0 }
 0xbc0   : > { %1900 = vtanh.f32 %v990_v40  ;;  %v1687_v43 = vmul.f32 -1.442695, %v990_v40  ;;  %v1701_v40 = vld [vmem:[%s1562_s13 + $0xe] sm:$0x3] }
 0xbc2   : > { %1902 = vpow2.f32 %v1687_v43 }
 0xbcd   : > { %v1901_v42 = vpop.eup %1900 }
 0xbce   : > { %1004 = vrot.lane.b32.xlu0 %v1901_v42, %s1958_s19 }
 0xbcf   : > { %v1903_v44 = vpop.eup %1902 }
 0xbd0   : > { %v994_v45 = vadd.f32 1.0, %v1903_v44 }
 0xbd2   : > { %1904 = vrcp.f32 %v994_v45 }
 0xbdf   : > { %v1905_v46 = vpop.eup %1904 }
 0xbe0   : > { %v1002_v50 = vmul.f32 %v1905_v46, %v1000_v49 }
 0xc40   : > { %v1005_v47 = vpop.permute.xlu0 %1004 }
 0xc41   : > { %v1007_v48 = vmul.f32 %v1905_v46, %v1005_v47 }
 0xc43   : > { %1009 = vrot.lane.b32.xlu0 %v1007_v48, %s1959_s20 }
 0xcb5   : > { %v1010_v51 = vpop.permute.xlu0 %1009 }
 0xcb6   : > { %v1012_v52 = vadd.f32 %v1010_v51, %v1002_v50 }
 0xcb8   : > { %1906 = vtanh.f32 %v1012_v52 }
 0xcc5   : > { %v1907_v53 = vpop.eup %1906 }
 0xcc6   : > { %1015 = vrot.lane.b32.xlu1 %v1907_v53, %s1958_s19 }
 0xcca   : > { %1025 = vrot.lane.b32.xlu1 %v1012_v52, %s1960_s26 }
 0xd38   : > { %v1016_v54 = vpop.permute.xlu1 %1015 }
 0xd39   : > { %v1018_v55 = vmul.f32 %v1905_v46, %v1016_v54 }
 0xd3b   : > { %1020 = vrot.lane.b32.xlu0 %v1018_v55, %s1959_s20 }
 0xd3c   : > { %v1026_v56 = vpop.permute.xlu1 %1025 }
 0xd3d   : > { %1028 = vst.msk [vmem:[#allocation3] sm:$0x3] %vm419_vm1, %v1026_v56 }
 0xd44   : > { %v1037_v57 = vld [vmem:[#allocation3] sm:$0x3] }
 0xd45   : > { %1120 = vrot.lane.b32.xlu1 %v1037_v57, %s1959_s20 }
 0xdad   : > { %v1021_v58 = vpop.permute.xlu0 %1020 }
 0xdae   : > { %1023 = vst.msk [vmem:[#allocation2] sm:$0x3] %vm419_vm1, %v1021_v58  ;;  %1030 = vst.msk [vmem:[%s1029_s29] sm:$0x3] %vm419_vm1, %v1021_v58 }
 0xdb5   : > { %v1036_v59 = vld [vmem:[#allocation2] sm:$0x3] }
 0xdb6   : > { %1815 = vmatmul.mubr.msk.f32.vlgmr.msra.gmra.mxu1 %vm433_vm2, %v1036_v59 }
 0xdb7   : > { %1829 = vmatpush3.msra.mxu1 %v2041_v2  ;;  %1836 = vmatprep.mubr.msk.f32.mxu1 %vm1957_vm0, %v1956_v0 }
 0xdb8   : > { %1830 = vmatprep.subr.mxu1 %v1956_v0 }
 0xdb9   : > { %1831 = vmatpush3.msra.mxu1 %v2043_v3 }
 0xdba   : > { %1832 = vmatprep.subr.mxu1 %v1956_v0 }
 0xdbb   : > { %1833 = vmatpush3.msra.mxu1 %v2050_v5 }
 0xdbc   : > { %1834 = vmatprep.subr.mxu1 %v1956_v0 }
 0xdbd   : > { %1835 = vmatpush3.msra.mxu1 %v2056_v6  ;;  %v1121_v6 = vpop.permute.xlu1 %1120 }
 0xe76   : > { %v1107_v2 = vpop.f32.mrf.mxu1 }
 0xe77   : > { %v1111_v61 = vadd.f32 %v1689_v60, %v1107_v2 }
 0xe78   : > { %v1816_v62 = vpop.f32.mrf.mxu1 }
 0xe79   : > { %1908 = vtanh.f32 %v1111_v61  ;;  %v1691_v3 = vmul.f32 -1.442695, %v1111_v61 }
 0xe7b   : > { %1910 = vpow2.f32 %v1691_v3 }
 0xe86   : > { %v1909_v63 = vpop.eup %1908 }
 0xe87   : > { %1125 = vrot.lane.b32.xlu0 %v1909_v63, %s1958_s19 }
 0xe88   : > { %v1911_v1 = vpop.eup %1910 }
 0xe89   : > { %v1115_v4 = vadd.f32 1.0, %v1911_v1 }
 0xe8b   : > { %1912 = vrcp.f32 %v1115_v4 }
 0xe98   : > { %v1913_v5 = vpop.eup %1912 }
 0xe99   : > { %v1123_v8 = vmul.f32 %v1913_v5, %v1121_v6 }
 0xef9   : > { %v1126_v0 = vpop.permute.xlu0 %1125 }
 0xefa   : > { %v1128_v7 = vmul.f32 %v1913_v5, %v1126_v0 }
 0xefc   : > { %1130 = vrot.lane.b32.xlu0 %v1128_v7, %s1959_s20 }
 0xf6e   : > { %v1131_v9 = vpop.permute.xlu0 %1130 }
 0xf6f   : > { %v1133_v10 = vadd.f32 %v1131_v9, %v1123_v8 }
 0xf71   : > { %1914 = vtanh.f32 %v1133_v10 }
 0xf7e   : > { %v1915_v11 = vpop.eup %1914 }
 0xf7f   : > { %1136 = vrot.lane.b32.xlu1 %v1915_v11, %s1958_s19 }
 0xf83   : > { %1146 = vrot.lane.b32.xlu1 %v1133_v10, %s1960_s26 }
 0xff1   : > { %v1137_v12 = vpop.permute.xlu1 %1136 }
 0xff2   : > { %v1139_v13 = vmul.f32 %v1913_v5, %v1137_v12 }
 0xff4   : > { %1141 = vrot.lane.b32.xlu0 %v1139_v13, %s1959_s20 }
 0xff5   : > { %v1147_v14 = vpop.permute.xlu1 %1146 }
 0xff6   : > { %1149 = vst.msk [vmem:[#allocation3] sm:$0x3] %vm419_vm1, %v1147_v14 }
 0xffd   : > { %v1158_v15 = vld [vmem:[#allocation3] sm:$0x3] }
 0xffe   : > { %1241 = vrot.lane.b32.xlu1 %v1158_v15, %s1959_s20 }
0x1066   : > { %v1142_v16 = vpop.permute.xlu0 %1141 }
0x1067   : > { %1144 = vst.msk [vmem:[#allocation2] sm:$0x3] %vm419_vm1, %v1142_v16  ;;  %1693 = vst.msk [vmem:[%s1550_s8 + $0xa] sm:$0x3] %vm419_vm1, %v1142_v16 }
0x106e   : > { %v1157_v17 = vld [vmem:[#allocation2] sm:$0x3] }
0x106f   : > { %1826 = vmatmul.mubr.msk.f32.vlgmr.msra.gmra.mxu0 %vm433_vm2, %v1157_v17 }
0x1070   : > { %v1242_v29 = vpop.permute.xlu1 %1241 }
0x112f   : > { %v1228_v19 = vpop.f32.mrf.mxu0 }
0x1130   : > { %v1232_v20 = vadd.f32 %v1695_v18, %v1228_v19 }
0x1131   : > { %v1827_v21 = vpop.f32.mrf.mxu0 }
0x1132   : > { %1916 = vtanh.f32 %v1232_v20  ;;  %v1697_v23 = vmul.f32 -1.442695, %v1232_v20 }
0x1134   : > { %1918 = vpow2.f32 %v1697_v23 }
0x113f   : > { %v1917_v22 = vpop.eup %1916 }
0x1140   : > { %1246 = vrot.lane.b32.xlu0 %v1917_v22, %s1958_s19 }
0x1141   : > { %v1919_v24 = vpop.eup %1918 }
0x1142   : > { %v1236_v25 = vadd.f32 1.0, %v1919_v24 }
0x1144   : > { %1920 = vrcp.f32 %v1236_v25 }
0x1151   : > { %v1921_v26 = vpop.eup %1920 }
0x1152   : > { %v1244_v30 = vmul.f32 %v1921_v26, %v1242_v29 }
0x11b2   : > { %v1247_v27 = vpop.permute.xlu0 %1246 }
0x11b3   : > { %v1249_v28 = vmul.f32 %v1921_v26, %v1247_v27 }
0x11b5   : > { %1251 = vrot.lane.b32.xlu0 %v1249_v28, %s1959_s20 }
0x1227   : > { %v1252_v31 = vpop.permute.xlu0 %1251 }
0x1228   : > { %v1254_v32 = vadd.f32 %v1252_v31, %v1244_v30 }
0x122a   : > { %1922 = vtanh.f32 %v1254_v32 }
0x1237   : > { %v1923_v33 = vpop.eup %1922 }
0x1238   : > { %1257 = vrot.lane.b32.xlu1 %v1923_v33, %s1958_s19 }
0x123c   : > { %1267 = vrot.lane.b32.xlu1 %v1254_v32, %s1960_s26 }
0x12aa   : > { %v1258_v34 = vpop.permute.xlu1 %1257 }
0x12ab   : > { %v1260_v35 = vmul.f32 %v1921_v26, %v1258_v34 }
0x12ad   : > { %1262 = vrot.lane.b32.xlu0 %v1260_v35, %s1959_s20 }
0x12ae   : > { %v1268_v36 = vpop.permute.xlu1 %1267 }
0x12af   : > { %1270 = vst.msk [vmem:[#allocation3] sm:$0x3] %vm419_vm1, %v1268_v36 }
0x12b6   : > { %v1279_v37 = vld [vmem:[#allocation3] sm:$0x3] }
0x12b7   : > { %1362 = vrot.lane.b32.xlu1 %v1279_v37, %s1959_s20 }
0x131f   : > { %v1263_v38 = vpop.permute.xlu0 %1262 }
0x1320   : > { %1265 = vst.msk [vmem:[#allocation2] sm:$0x3] %vm419_vm1, %v1263_v38  ;;  %1699 = vst.msk [vmem:[%s1558_s11 + $0xc] sm:$0x3] %vm419_vm1, %v1263_v38 }
0x1327   : > { %v1278_v39 = vld [vmem:[#allocation2] sm:$0x3] }
0x1328   : > { %1837 = vmatmul.mubr.msk.f32.vlgmr.msra.gmra.mxu1 %vm433_vm2, %v1278_v39 }
0x1329   : > { %v1363_v51 = vpop.permute.xlu1 %1362 }
0x13e8   : > { %v1349_v41 = vpop.f32.mrf.mxu1 }
0x13e9   : > { %v1353_v42 = vadd.f32 %v1701_v40, %v1349_v41 }
0x13ea   : > { %v1838_v43 = vpop.f32.mrf.mxu1 }
0x13eb   : > { %1924 = vtanh.f32 %v1353_v42  ;;  %v1703_v45 = vmul.f32 -1.442695, %v1353_v42 }
0x13ed   : > { %1926 = vpow2.f32 %v1703_v45 }
0x13f8   : > { %v1925_v44 = vpop.eup %1924 }
0x13f9   : > { %1367 = vrot.lane.b32.xlu0 %v1925_v44, %s1958_s19 }
0x13fa   : > { %v1927_v46 = vpop.eup %1926 }
0x13fb   : > { %v1357_v47 = vadd.f32 1.0, %v1927_v46 }
0x13fd   : > { %1928 = vrcp.f32 %v1357_v47 }
0x140a   : > { %v1929_v48 = vpop.eup %1928 }
0x140b   : > { %v1365_v52 = vmul.f32 %v1929_v48, %v1363_v51 }
0x146b   : > { %v1368_v49 = vpop.permute.xlu0 %1367 }
0x146c   : > { %v1370_v50 = vmul.f32 %v1929_v48, %v1368_v49 }
0x146e   : > { %1372 = vrot.lane.b32.xlu0 %v1370_v50, %s1959_s20 }
0x14e0   : > { %v1373_v53 = vpop.permute.xlu0 %1372 }
0x14e1   : > { %v1375_v54 = vadd.f32 %v1373_v53, %v1365_v52 }
0x14e3   : > { %1930 = vtanh.f32 %v1375_v54 }
0x14f0   : > { %v1931_v55 = vpop.eup %1930 }
0x14f1   : > { %1378 = vrot.lane.b32.xlu1 %v1931_v55, %s1958_s19 }
0x14f5   : > { %1388 = vrot.lane.b32.xlu1 %v1375_v54, %s1960_s26 }
0x1563   : > { %v1379_v56 = vpop.permute.xlu1 %1378 }
0x1564   : > { %v1381_v57 = vmul.f32 %v1929_v48, %v1379_v56 }
0x1566   : > { %1383 = vrot.lane.b32.xlu0 %v1381_v57, %s1959_s20  ;;  %s409_s20 = scalar_lea.vmem %s2300_s5, %s2028_s27 }
0x1567   : > { %v1389_v58 = vpop.permute.xlu1 %1388 }
0x1568   : > { %1391 = vst.msk [vmem:[#allocation3] sm:$0x3] %vm419_vm1, %v1389_v58 }
0x156f   : > { %v1396_v59 = vld [vmem:[#allocation3] sm:$0x3] }
0x1570   : > { %1397 = vst.msk [vmem:[%s413_s15] sm:$0x3] %vm419_vm1, %v1396_v59 }
0x15d8   : > { %v1384_v60 = vpop.permute.xlu0 %1383 }
0x15d9   : > { %1386 = vst.msk [vmem:[#allocation2] sm:$0x3] %vm419_vm1, %v1384_v60  ;;  %1705 = vst.msk [vmem:[%s1566_s16 + $0xe] sm:$0x3] %vm419_vm1, %v1384_v60 }
0x15e0   : > { %v1394_v2 = vld [vmem:[#allocation2] sm:$0x3] }
0x15e1   : > { %1395 = vst.msk [vmem:[%s409_s20] sm:$0x3] %vm419_vm1, %v1394_v2 }
0x15e2 PF: > { %s17_s23 = sadd.s32 1, %s1954_s23   ;;  %s2302_s21 = smov %s1950_s22 }
0x15e3   : > { %p14_p5 = scmp.ge.s32.totalorder %s17_s23, 4   ;;  %s2303_s22 = smov %s2305_s24 }
0x15e5   :  { %16 = sbr.rel (!%p14_p5) target bundleno = 2 (0x2), region = 119 }

</bundles_post_ra>
